<compile_context>
chip_gen: v7x
topology: tpu7x:2x2x1
jax: 0.10.0
libtpu: 0.0.40
codegen_flags: <defaults>
</compile_context>

<pallas_src>
import jax
import jax.numpy as jnp
import numpy as np
from jax.experimental import pallas as pl
from jax.experimental.pallas import tpu as pltpu


def fusion_kernel(x_ref, s_ref, st_ref, r1_ref, r2_ref,
                  w1_ref, b1_ref, w2_ref, b2_ref, o_ref):
    """One batch tile; each kernel row packs G consecutive batch rows.

    x_ref  : VMEM (TBg, Dp)        packed features, Dp = G*(d1+d2), f32
    s_ref  : VMEM (Dp, 2G)         0/1 segment-sum matrix (per packed row: G*(f1,f2) segments)
    st_ref : VMEM (2G, Dp)         transpose of s_ref (broadcast-back)
    r1_ref : VMEM (Dp, G*T)        0/1 replication: column q*T + i*d2 + j <- f1 lane i of group q
    r2_ref : VMEM (Dp, G*T)        0/1 replication: column q*T + i*d2 + j <- f2 lane j of group q
    w1_ref : VMEM (G*T, G*H1)      bf16 block-diag of (fusion_weight * W1).T
    b1_ref : VMEM (1, G*H1)        f32, b1 tiled G times
    w2_ref : VMEM (G*H1, G*H2)     bf16 block-diag of W2.T
    b2_ref : VMEM (1, G*H2)        f32, b2 tiled G times
    o_ref  : VMEM (TBg, G*H2)      f32, naturally 128-lane-dense packed output
    """
    x = x_ref[...].astype(jnp.float32)                                        # (TBg, Dp)

    # --- L2 normalization (torch F.normalize, eps=1e-12) via per-segment sums.
    #     0/1 matmuls keep it lane-parallel; rsqrt goes to the idle EUP slot.
    sumsq = jnp.dot(x * x, s_ref[...], preferred_element_type=jnp.float32)    # (TBg, 2G)
    inv = jax.lax.rsqrt(jnp.maximum(sumsq, jnp.float32(1e-24)))               # == 1/max(||x||, 1e-12)
    xn = x * jnp.dot(inv, st_ref[...], preferred_element_type=jnp.float32)    # (TBg, Dp)

    # --- Flattened tensor product, packed & lane-dense:
    #     tp[r, q*T + i*d2 + j] = f1n[G*r+q, i] * f2n[G*r+q, j]
    #     f32 0/1 selection matmuls are exact -> single bf16 rounding point (tp).
    e1 = jnp.dot(xn, r1_ref[...], preferred_element_type=jnp.float32)         # (TBg, G*T)
    e2 = jnp.dot(xn, r2_ref[...], preferred_element_type=jnp.float32)         # (TBg, G*T)
    tp = (e1 * e2).astype(jnp.bfloat16)

    # --- Linear1 + ReLU (fusion_weights[0,1] pre-folded into w1 in f32).
    h = jnp.dot(tp, w1_ref[...], preferred_element_type=jnp.float32) + b1_ref[...]
    h = jnp.maximum(h, 0.0).astype(jnp.bfloat16)

    # TODO(synk): nn.Dropout(0.1) treated as identity (eval/inference semantics).

    # --- Linear2: block-diagonal weights give a packed, 128-lane-dense output row
    #     (G batch rows per row) -> unmasked stores, zero padding traffic.
    out = jnp.dot(h, w2_ref[...], preferred_element_type=jnp.float32) + b2_ref[...]
    o_ref[...] = out.astype(o_ref.dtype)


def _round_up(x, m):
    return ((x + m - 1) // m) * m


def tensor_product_fusion(feat1, feat2, fusion_weights, W1, b1, W2, b2,
                          output_dim, *, block_b=512):
    """Glue: one-time parameter re-layout + batched pallas_call."""
    B, d1 = feat1.shape
    _, d2 = feat2.shape
    H1 = W1.shape[0]              # output_dim * 4
    H2 = output_dim
    T = d1 * d2
    dcat = d1 + d2

    # Pack G consecutive batch rows per kernel row so the output is 128-lane-dense.
    LANES = 128
    G = LANES // H2 if (H2 <= LANES and LANES % H2 == 0) else 1
    Dp = G * dcat

    # ---- batch tiling: TB rows per grid step (multiple of G*8 sublanes) ----
    SUB = 8
    ALIGN = G * SUB
    TB = max(min(block_b, _round_up(B, ALIGN)), ALIGN)
    TB = _round_up(TB, ALIGN)
    if B > ALIGN:
        # Guarantee >= 2 grid steps so the "parallel" batch axis feeds both
        # TensorCores on v7x (no-op on v5e/v6e single-TC parts).
        TB = min(TB, _round_up(pl.cdiv(B, 2), ALIGN))
    nb = pl.cdiv(B, TB)
    Bp = nb * TB
    TBg = TB // G

    # ---- input packing (concat is one small copy; the reshape is a free view) ----
    feat_cat = jnp.concatenate([feat1.astype(jnp.float32),
                                feat2.astype(jnp.float32)], axis=1)     # (B, dcat)
    if Bp != B:
        feat_cat = jnp.pad(feat_cat, ((0, Bp - B), (0, 0)))
    x_packed = feat_cat.reshape(Bp // G, Dp)                            # (Bp/G, Dp)

    # ---- constant 0/1 matrices (numpy, built once) ----
    # Segment-sum matrix: 2 segments (f1, f2) per packed group.
    S_np = np.zeros((Dp, 2 * G), np.float32)
    for q in range(G):
        S_np[q * dcat: q * dcat + d1, 2 * q] = 1.0
        S_np[q * dcat + d1: (q + 1) * dcat, 2 * q + 1] = 1.0
    St_np = np.ascontiguousarray(S_np.T)

    # Replication matrices: column q*T + i*d2 + j <- (f1 lane i | f2 lane j) of group q.
    r1_blk = np.kron(np.eye(d1, dtype=np.float32), np.ones((1, d2), np.float32))  # (d1, T)
    r2_blk = np.kron(np.ones((1, d1), np.float32), np.eye(d2, dtype=np.float32))  # (d2, T)
    rcat1 = np.concatenate([r1_blk, np.zeros((d2, T), np.float32)], axis=0)       # (dcat, T)
    rcat2 = np.concatenate([np.zeros((d1, T), np.float32), r2_blk], axis=0)       # (dcat, T)
    R1_np = np.kron(np.eye(G, dtype=np.float32), rcat1)                           # (Dp, G*T)
    R2_np = np.kron(np.eye(G, dtype=np.float32), rcat2)                           # (Dp, G*T)

    # ---- parameter re-layout: fold fusion weight into W1 (f32), block-diag expand ----
    w01 = fusion_weights[0, 1].astype(jnp.float32)
    W1_eff_T = (W1.astype(jnp.float32) * w01).T                                   # (T, H1)
    eyeG = jnp.eye(G, dtype=jnp.float32)
    W1_big = jnp.kron(eyeG, W1_eff_T).astype(jnp.bfloat16)                        # (G*T, G*H1)
    W2_big = jnp.kron(eyeG, W2.astype(jnp.float32).T).astype(jnp.bfloat16)        # (G*H1, G*H2)
    b1_big = jnp.tile(b1.astype(jnp.float32), G).reshape(1, G * H1)
    b2_big = jnp.tile(b2.astype(jnp.float32), G).reshape(1, G * H2)

    out = pl.pallas_call(
        fusion_kernel,
        out_shape=jax.ShapeDtypeStruct((Bp // G, G * H2), jnp.float32),
        grid=(nb,),
        in_specs=[
            pl.BlockSpec((TBg, Dp), lambda i: (i, 0)),            # packed feature tile
            pl.BlockSpec((Dp, 2 * G), lambda i: (0, 0)),          # S       (resident)
            pl.BlockSpec((2 * G, Dp), lambda i: (0, 0)),          # S.T     (resident)
            pl.BlockSpec((Dp, G * T), lambda i: (0, 0)),          # R1      (resident)
            pl.BlockSpec((Dp, G * T), lambda i: (0, 0)),          # R2      (resident)
            pl.BlockSpec((G * T, G * H1), lambda i: (0, 0)),      # W1_big  (resident)
            pl.BlockSpec((1, G * H1), lambda i: (0, 0)),          # b1      (resident)
            pl.BlockSpec((G * H1, G * H2), lambda i: (0, 0)),     # W2_big  (resident)
            pl.BlockSpec((1, G * H2), lambda i: (0, 0)),          # b2      (resident)
        ],
        out_specs=pl.BlockSpec((TBg, G * H2), lambda i: (i, 0)),
        compiler_params=pltpu.CompilerParams(
            dimension_semantics=("parallel",)),   # shards batch over v7x's 2 TCs
    )(x_packed, jnp.asarray(S_np), jnp.asarray(St_np), jnp.asarray(R1_np),
      jnp.asarray(R2_np), W1_big, b1_big, W2_big, b2_big)

    # Unpack: free row-major view (Bp/G, G*H2) -> (Bp, H2), then drop pad rows.
    return out.reshape(Bp, H2)[:B]


def reference_forward(feat1, feat2, fusion_weights, W1, b1, W2, b2):
    """Pure-JAX f32 reference mirroring the PyTorch module (eval mode)."""
    def l2norm(x):
        n = jnp.sqrt(jnp.sum(x * x, axis=-1, keepdims=True))
        return x / jnp.maximum(n, 1e-12)

    f1n, f2n = l2norm(feat1), l2norm(feat2)
    tp = jnp.einsum('bi,bj->bij', f1n, f2n) * fusion_weights[0, 1]
    tp = tp.reshape(feat1.shape[0], -1)
    h = jnp.maximum(tp @ W1.T + b1, 0.0)
    return h @ W2.T + b2


if __name__ == "__main__":
    # Small shapes consistent with the module: 2 modalities.
    B = 48                           # with block_b=32 -> 2 grid steps + pad rows exercised
    modality_dims = [8, 16]          # d1, d2 -> total_product_dim = 128
    output_dim = 32                  # hidden = output_dim * 4 = 128
    d1, d2 = modality_dims
    H1 = output_dim * 4
    total = d1 * d2

    key = jax.random.PRNGKey(0)
    k = jax.random.split(key, 7)

    # Deterministic synthetic parameters (shapes from __init__).
    # fusion_weights: nn.Parameter(randn(M, M)) -- kept random (pre-eye_ init)
    # so the outer-product scaling path is numerically exercised.
    fusion_weights = jax.random.normal(k[0], (2, 2), dtype=jnp.float32)
    W1 = jax.random.normal(k[1], (H1, total), dtype=jnp.float32) * (1.0 / np.sqrt(total))
    b1 = jax.random.normal(k[2], (H1,), dtype=jnp.float32) * 0.01
    W2 = jax.random.normal(k[3], (output_dim, H1), dtype=jnp.float32) * (1.0 / np.sqrt(H1))
    b2 = jax.random.normal(k[4], (output_dim,), dtype=jnp.float32) * 0.01

    # Deterministic inputs: list of modality tensors [(B, d1), (B, d2)].
    feat1 = jax.random.normal(k[5], (B, d1), dtype=jnp.float32)
    feat2 = jax.random.normal(k[6], (B, d2), dtype=jnp.float32)

    out = tensor_product_fusion(feat1, feat2, fusion_weights, W1, b1, W2, b2,
                                output_dim, block_b=32)
    out = jax.block_until_ready(out)

    ref = reference_forward(feat1, feat2, fusion_weights, W1, b1, W2, b2)
    # bf16 MXU operands (f32 accumulation) -> tolerances loosened vs pure f32.
    np.testing.assert_allclose(np.asarray(out), np.asarray(ref), rtol=2e-2, atol=2e-2)

    print("KERNEL_OK")
</pallas_src>

<mosaic_0001>
module attributes {stable_mosaic.version = 11 : i64} {
  func.func @fusion_kernel(%arg0: i32, %arg1: memref<8x96xf32, #tpu.memory_space<vmem>>, %arg2: memref<96x8xf32, #tpu.memory_space<vmem>>, %arg3: memref<8x96xf32, #tpu.memory_space<vmem>>, %arg4: memref<96x512xf32, #tpu.memory_space<vmem>>, %arg5: memref<96x512xf32, #tpu.memory_space<vmem>>, %arg6: memref<512x512xbf16, #tpu.memory_space<vmem>>, %arg7: memref<1x512xf32, #tpu.memory_space<vmem>>, %arg8: memref<512x128xbf16, #tpu.memory_space<vmem>>, %arg9: memref<1x128xf32, #tpu.memory_space<vmem>>, %arg10: memref<8x128xf32, #tpu.memory_space<vmem>>) attributes {dimension_semantics = [#tpu.dimension_semantics<parallel>], iteration_bounds = array<i64: 2>, scalar_prefetch = 0 : i64, scratch_operands = 0 : i64, tpu.core_type = #tpu.core_type<tc>, window_params = [{transform_indices = @transform_0, window_bounds = array<i64: 8, 96>}, {pipeline_mode = #tpu.pipeline_mode<synchronous>, transform_indices = @transform_1, window_bounds = array<i64: 96, 8>}, {pipeline_mode = #tpu.pipeline_mode<synchronous>, transform_indices = @transform_2, window_bounds = array<i64: 8, 96>}, {pipeline_mode = #tpu.pipeline_mode<synchronous>, transform_indices = @transform_3, window_bounds = array<i64: 96, 512>}, {pipeline_mode = #tpu.pipeline_mode<synchronous>, transform_indices = @transform_4, window_bounds = array<i64: 96, 512>}, {pipeline_mode = #tpu.pipeline_mode<synchronous>, transform_indices = @transform_5, window_bounds = array<i64: 512, 512>}, {pipeline_mode = #tpu.pipeline_mode<synchronous>, transform_indices = @transform_6, window_bounds = array<i64: 1, 512>}, {pipeline_mode = #tpu.pipeline_mode<synchronous>, transform_indices = @transform_7, window_bounds = array<i64: 512, 128>}, {pipeline_mode = #tpu.pipeline_mode<synchronous>, transform_indices = @transform_8, window_bounds = array<i64: 1, 128>}, {transform_indices = @transform_9, window_bounds = array<i64: 8, 128>}]} {
    %c0 = arith.constant 0 : index
    %c0_0 = arith.constant 0 : index
    %0 = vector.load %arg1[%c0, %c0_0] : memref<8x96xf32, #tpu.memory_space<vmem>>, vector<8x96xf32>
    %1 = arith.mulf %0, %0 : vector<8x96xf32>
    %c0_1 = arith.constant 0 : index
    %c0_2 = arith.constant 0 : index
    %2 = vector.load %arg2[%c0_1, %c0_2] : memref<96x8xf32, #tpu.memory_space<vmem>>, vector<96x8xf32>
    %cst = arith.constant dense<0.000000e+00> : vector<8x8xf32>
    %3 = tpu.matmul %1, %2, %cst {dimension_numbers = #tpu.dot_dimension_numbers<[1], [0], [0], [1], [0, 0, 1, 1], [], []>} : vector<8x96xf32>, vector<96x8xf32>, vector<8x8xf32> -> vector<8x8xf32>
    %cst_3 = arith.constant 1.000000e-24 : f32
    %4 = vector.broadcast %cst_3 : f32 to vector<8x8xf32>
    %5 = arith.maximumf %3, %4 : vector<8x8xf32>
    %6 = math.rsqrt %5 : vector<8x8xf32>
    %c0_4 = arith.constant 0 : index
    %c0_5 = arith.constant 0 : index
    %7 = vector.load %arg3[%c0_4, %c0_5] : memref<8x96xf32, #tpu.memory_space<vmem>>, vector<8x96xf32>
    %cst_6 = arith.constant dense<0.000000e+00> : vector<8x96xf32>
    %8 = tpu.matmul %6, %7, %cst_6 {dimension_numbers = #tpu.dot_dimension_numbers<[1], [0], [0], [1], [0, 0, 1, 1], [], []>} : vector<8x8xf32>, vector<8x96xf32>, vector<8x96xf32> -> vector<8x96xf32>
    %9 = arith.mulf %0, %8 : vector<8x96xf32>
    %c0_7 = arith.constant 0 : index
    %c0_8 = arith.constant 0 : index
    %10 = vector.load %arg4[%c0_7, %c0_8] : memref<96x512xf32, #tpu.memory_space<vmem>>, vector<96x512xf32>
    %cst_9 = arith.constant dense<0.000000e+00> : vector<8x512xf32>
    %11 = tpu.matmul %9, %10, %cst_9 {dimension_numbers = #tpu.dot_dimension_numbers<[1], [0], [0], [1], [0, 0, 1, 1], [], []>} : vector<8x96xf32>, vector<96x512xf32>, vector<8x512xf32> -> vector<8x512xf32>
    %c0_10 = arith.constant 0 : index
    %c0_11 = arith.constant 0 : index
    %12 = vector.load %arg5[%c0_10, %c0_11] : memref<96x512xf32, #tpu.memory_space<vmem>>, vector<96x512xf32>
    %cst_12 = arith.constant dense<0.000000e+00> : vector<8x512xf32>
    %13 = tpu.matmul %9, %12, %cst_12 {dimension_numbers = #tpu.dot_dimension_numbers<[1], [0], [0], [1], [0, 0, 1, 1], [], []>} : vector<8x96xf32>, vector<96x512xf32>, vector<8x512xf32> -> vector<8x512xf32>
    %14 = arith.mulf %11, %13 : vector<8x512xf32>
    %15 = arith.truncf %14 : vector<8x512xf32> to vector<8x512xbf16>
    %c0_13 = arith.constant 0 : index
    %c0_14 = arith.constant 0 : index
    %16 = vector.load %arg6[%c0_13, %c0_14] : memref<512x512xbf16, #tpu.memory_space<vmem>>, vector<512x512xbf16>
    %cst_15 = arith.constant dense<0.000000e+00> : vector<8x512xf32>
    %17 = tpu.matmul %15, %16, %cst_15 {dimension_numbers = #tpu.dot_dimension_numbers<[1], [0], [0], [1], [0, 0, 1, 1], [], []>} : vector<8x512xbf16>, vector<512x512xbf16>, vector<8x512xf32> -> vector<8x512xf32>
    %c0_16 = arith.constant 0 : index
    %c0_17 = arith.constant 0 : index
    %18 = vector.load %arg7[%c0_16, %c0_17] : memref<1x512xf32, #tpu.memory_space<vmem>>, vector<1x512xf32>
    %19 = vector.broadcast %18 : vector<1x512xf32> to vector<8x512xf32>
    %20 = arith.addf %17, %19 : vector<8x512xf32>
    %cst_18 = arith.constant 0.000000e+00 : f32
    %21 = vector.broadcast %cst_18 : f32 to vector<8x512xf32>
    %22 = arith.maximumf %20, %21 : vector<8x512xf32>
    %23 = arith.truncf %22 : vector<8x512xf32> to vector<8x512xbf16>
    %c0_19 = arith.constant 0 : index
    %c0_20 = arith.constant 0 : index
    %24 = vector.load %arg8[%c0_19, %c0_20] : memref<512x128xbf16, #tpu.memory_space<vmem>>, vector<512x128xbf16>
    %cst_21 = arith.constant dense<0.000000e+00> : vector<8x128xf32>
    %25 = tpu.matmul %23, %24, %cst_21 {dimension_numbers = #tpu.dot_dimension_numbers<[1], [0], [0], [1], [0, 0, 1, 1], [], []>} : vector<8x512xbf16>, vector<512x128xbf16>, vector<8x128xf32> -> vector<8x128xf32>
    %c0_22 = arith.constant 0 : index
    %c0_23 = arith.constant 0 : index
    %26 = vector.load %arg9[%c0_22, %c0_23] : memref<1x128xf32, #tpu.memory_space<vmem>>, vector<1x128xf32>
    %27 = vector.broadcast %26 : vector<1x128xf32> to vector<8x128xf32>
    %28 = arith.addf %25, %27 : vector<8x128xf32>
    %c0_24 = arith.constant 0 : index
    %c0_25 = arith.constant 0 : index
    %29 = vector.load %arg10[%c0_24, %c0_25] : memref<8x128xf32, #tpu.memory_space<vmem>>, vector<8x128xf32>
    tpu.vector_store %arg10[%c0_24, %c0_25], %28 {strides = array<i32>} : memref<8x128xf32, #tpu.memory_space<vmem>>, vector<8x128xf32>,
    return
  }
  func.func @transform_0(%arg0: i32) -> (i32, i32) {
    %c0_i32 = arith.constant 0 : i32
    %c0_i32_0 = arith.constant 0 : i32
    return %arg0, %c0_i32 : i32, i32
  }
  func.func @transform_1(%arg0: i32) -> (i32, i32) {
    %c0_i32 = arith.constant 0 : i32
    %c0_i32_0 = arith.constant 0 : i32
    %c0_i32_1 = arith.constant 0 : i32
    return %c0_i32, %c0_i32_0 : i32, i32
  }
  func.func @transform_2(%arg0: i32) -> (i32, i32) {
    %c0_i32 = arith.constant 0 : i32
    %c0_i32_0 = arith.constant 0 : i32
    %c0_i32_1 = arith.constant 0 : i32
    return %c0_i32, %c0_i32_0 : i32, i32
  }
  func.func @transform_3(%arg0: i32) -> (i32, i32) {
    %c0_i32 = arith.constant 0 : i32
    %c0_i32_0 = arith.constant 0 : i32
    %c0_i32_1 = arith.constant 0 : i32
    return %c0_i32, %c0_i32_0 : i32, i32
  }
  func.func @transform_4(%arg0: i32) -> (i32, i32) {
    %c0_i32 = arith.constant 0 : i32
    %c0_i32_0 = arith.constant 0 : i32
    %c0_i32_1 = arith.constant 0 : i32
    return %c0_i32, %c0_i32_0 : i32, i32
  }
  func.func @transform_5(%arg0: i32) -> (i32, i32) {
    %c0_i32 = arith.constant 0 : i32
    %c0_i32_0 = arith.constant 0 : i32
    %c0_i32_1 = arith.constant 0 : i32
    return %c0_i32, %c0_i32_0 : i32, i32
  }
  func.func @transform_6(%arg0: i32) -> (i32, i32) {
    %c0_i32 = arith.constant 0 : i32
    %c0_i32_0 = arith.constant 0 : i32
    %c0_i32_1 = arith.constant 0 : i32
    return %c0_i32, %c0_i32_0 : i32, i32
  }
  func.func @transform_7(%arg0: i32) -> (i32, i32) {
    %c0_i32 = arith.constant 0 : i32
    %c0_i32_0 = arith.constant 0 : i32
    %c0_i32_1 = arith.constant 0 : i32
    return %c0_i32, %c0_i32_0 : i32, i32
  }
  func.func @transform_8(%arg0: i32) -> (i32, i32) {
    %c0_i32 = arith.constant 0 : i32
    %c0_i32_0 = arith.constant 0 : i32
    %c0_i32_1 = arith.constant 0 : i32
    return %c0_i32, %c0_i32_0 : i32, i32
  }
  func.func @transform_9(%arg0: i32) -> (i32, i32) {
    %c0_i32 = arith.constant 0 : i32
    %c0_i32_0 = arith.constant 0 : i32
    return %arg0, %c0_i32 : i32, i32
  }
}

</mosaic_0001>

<bundles_post_ra>
// kernel: tpu_custom_call.1
= control target key start
LH: loop header
LB: loop body
LE: loop exit
PB: predicated region body
PF: predicated region fallthrough
CT: control target
= control target key end

     0   :  { %14 = vsyncpa [#allocation3], 0  ;;  %s3628_s0 = inlined_call_operand.vmem [shape: f32[16,96], index: 0, kind: input, shape index: {}]   ;;  %s3629_s1 = inlined_call_operand.vmem [shape: f32[96,8], index: 1, kind: input, shape index: {}]   ;;  %s3630_s2 = inlined_call_operand.vmem [shape: f32[8,96], index: 2, kind: input, shape index: {}]   ;;  %s3631_s3 = inlined_call_operand.hbm [shape: f32[96,512], index: 3, kind: input, shape index: {}]   ;;  %s3632_s4 = inlined_call_operand.hbm [shape: f32[96,512], index: 4, kind: input, shape index: {}]   ;;  %s3633_s5 = inlined_call_operand.hbm [shape: bf16[512,512], index: 5, kind: input, shape index: {}]   ;;  %s3634_s6 = inlined_call_operand.vmem [shape: f32[1,512], index: 6, kind: input, shape index: {}]   ;;  %s3635_s7 = inlined_call_operand.hbm [shape: bf16[512,128], index: 7, kind: input, shape index: {}]   ;;  %s3636_s8 = inlined_call_operand.vmem [shape: f32[1,128], index: 8, kind: input, shape index: {}]   ;;  %s3637_s9 = inlined_call_operand.hbm [shape: f32[16,128], index: 9, kind: output, shape index: {}]  }
   0x1   :  { %15 = vsyncpa [#allocation6], 0 }
   0x2   :  { %16 = vsyncpa [#allocation9], 0 }
   0x3   :  { %17 = vsyncpa [#allocation4], 0 }
   0x4   :  { %19 = vsyncpa [#allocation4 + $0x1], 0  ;;  %s3334_s30 = smov 0   ;;  %s3336_s10 = smov 0  }
   0x5   :  { %s3338_s11 = smov 0   ;;  %s3340_s12 = smov 0  }
   0x6 LB: > { %3646 = sst [smem:[#allocation15_spill]] %s3256_s30  ;;  %s3355_s13 = sadd.s32 4294967295, %s3268_s12   ;;  %s3268_s12 = sphi %s3340_s12, %s3667_s12   ;;  %s3264_s11 = sphi %s3338_s11, %s3669_s11   ;;  %s3260_s10 = sphi %s3336_s10, %s3671_s10   ;;  %s3256_s30 = sphi %s3334_s30, %s3670_s30  }
   0x7   : > { %3647 = sst [smem:[#allocation16_spill]] %s3264_s11  ;;  %s2365_s14 = sadd.s32 4294967294, %s3268_s12  }
   0x8   : > { %s3359_s15 = sadd.s32 1, %s3268_s12   ;;  %s226_s16 = sadd.s32 1, %s3264_s11 }
   0x9   : > { %3648 = sst [smem:[#allocation17_spill]] %s3359_s15  ;;  %s223_s17 = ssub.s32 %s3268_s12, %s3359_s15 }
   0xa   : > { %p236_p0 = scmp.ne.s32.totalorder %s3264_s11, %s3260_s10  ;;  %p224_p1 = scmp.eq.s32.totalorder %s223_s17, 0 }
   0xb   : > { %p237_p2 = scmp.eq.s32.totalorder %s3355_s13, 1  ;;  %p242_p3 = scmp.ne.s32.totalorder %s3260_s10, %s3256_s30 }
   0xc   : > { %p243_p4 = scmp.eq.s32.totalorder %s2365_s14, 1  ;;  %p2366_p7 = scmp.ge.s32.totalorder %s3268_s12, 1 }
   0xd   : > { %s3370_s18 = scalar_select %p224_p1, %s3264_s11, %s226_s16  }
   0xe   : > { %p3372_p5 = por %p237_p2, %p236_p0  ;;  %p3376_p6 = por %p243_p4, %p242_p3 }
   0xf   : > { %3649 = sst [smem:[#allocation18_spill]] %s3370_s18  ;;  %p250_p8 = scmp.lt.s32.totalorder %s3268_s12, 3 }
  0x10   : > { %s3650_s19 = scalar_select %p3372_p5, 1, 0 }
  0x11   : > { %s3651_s20 = scalar_select %p3376_p6, 1, 0 }
  0x12   : > { %p3638_p9 = scmp.eq.s32.totalorder %s3355_s13, 0  ;;  %p3383_p10 = pnand %p2366_p7, %p250_p8 }
  0x13   : > { %3652 = sst [smem:[#allocation19_spill]] %s3651_s20  ;;  %s3270_s22 = smov [#allocation5]  }
  0x14   : > { %s3653_s21 = scalar_select %p3383_p10, 1, 0 }
  0x15   : > { %p2785_p11 = pneg %p3383_p10  ;;  %s281_s23 = sshll.u32 %s3270_s22, 4  ;;  %s3389_s23 = int_to_ptr.vmem [resolvable:$true] %s281_s23 }
  0x16   : > { %s3271_s25 = smov [#allocation2]   ;;  %s3272_s27 = smov [#allocation7]  }
  0x17   : > { %p3393_p12 = pnand %p3638_p9, %p2785_p11  ;;  %s268_s26 = sshll.u32 %s3271_s25, 4  ;;  %s3397_s26 = int_to_ptr.vmem [resolvable:$true] %s268_s26 }
  0x18   : > { %s3399_s28 = sshll.u32 %s3272_s27, 4  ;;  %s3082_s16 = scalar_lea.hbm %s3632_s4, 6144  ;;  %s295_s28 = int_to_ptr.vmem [resolvable:$true] %s3399_s28 }
  0x19   : > { %p3083_p13 = scmp.ne.s32.totalorder %s3632_s4, %s3082_s16  ;;  %p3409_p0 = pneg %p3393_p12 }
  0x1a   : > { %p3089_p3 = scmp.lt.u32.totalorder %s3082_s16, %s3632_s4 }
  0x1b   : > { %p3085_p1 = pnand %p3409_p0, %p3083_p13 }
  0x1d   : > { %p3086_p2 = pneg %p3085_p1 }
  0x1f   : > { %p3091_p4 = pnand %p3089_p3, %p3086_p2 }
  0x21   : > { %3094 = shalt.err (!%p3091_p4)
}
  0x22   : > { %s3095_s29 = scalar_lea.vmem %s3389_s23, 6144  ;;  %p3103_p9 = scmp.lt.s32.totalorder %s3389_s23, %s3389_s23 }
  0x23   : > { %p3096_p7 = scmp.ne.s32.totalorder %s3389_s23, %s3095_s29  ;;  %p3104_p6 = scmp.lt.s32.totalorder %s3095_s29, %s3095_s29 }
  0x25   : > { %p3098_p8 = pnand %p3096_p7, %p3409_p0  ;;  %p3105_p13 = por %p3104_p6, %p3103_p9 }
  0x27   : > { %p3099_p11 = pneg %p3098_p8 }
  0x29   : > { %p3106_p1 = pnand %p3105_p13, %p3099_p11 }
  0x2b   : > { %3109 = shalt.err (!%p3106_p1)
}
  0x2c   : > { %s3273_s14 = smov 512   ;;  %s3274_s16 = smov 32  }
  0x2d   : > { %2791 = dma.hbm_to_vmem [thread:$0]  (!%p3393_p12), %s3632_s4, 6144, %s3389_s23, [#allocation6], %s3273_s14, %s3273_s14, %s3274_s16  }
  0x2e   : > { %s3110_s11 = scalar_lea.hbm %s3631_s3, 6144 }
  0x2f   : > { %p3111_p6 = scmp.ne.s32.totalorder %s3631_s3, %s3110_s11  ;;  %p3117_p3 = scmp.lt.u32.totalorder %s3110_s11, %s3631_s3 }
  0x31   : > { %p3113_p9 = pnand %p3111_p6, %p3409_p0 }
  0x33   : > { %p3114_p2 = pneg %p3113_p9 }
  0x35   : > { %p3119_p4 = pnand %p3117_p3, %p3114_p2 }
  0x37   : > { %3122 = shalt.err (!%p3119_p4)
}
  0x38   : > { %s3123_s23 = scalar_lea.vmem %s3397_s26, 6144  ;;  %p3131_p13 = scmp.lt.s32.totalorder %s3397_s26, %s3397_s26 }
  0x39   : > { %p3124_p7 = scmp.ne.s32.totalorder %s3397_s26, %s3123_s23  ;;  %p3132_p1 = scmp.lt.s32.totalorder %s3123_s23, %s3123_s23 }
  0x3b   : > { %p3126_p8 = pnand %p3124_p7, %p3409_p0  ;;  %p3133_p6 = por %p3132_p1, %p3131_p13 }
  0x3d   : > { %p3127_p11 = pneg %p3126_p8 }
  0x3f   : > { %p3134_p9 = pnand %p3133_p6, %p3127_p11 }
  0x41   : > { %3137 = shalt.err (!%p3134_p9)
}
  0x42   : > { %2788 = dma.hbm_to_vmem [thread:$0]  (!%p3393_p12), %s3631_s3, 6144, %s3397_s26, [#allocation3], %s3273_s14, %s3273_s14, %s3274_s16  }
  0x43   : > { %s3138_s17 = scalar_lea.hbm %s3633_s5, 16384 }
  0x44   : > { %p3139_p2 = scmp.ne.s32.totalorder %s3633_s5, %s3138_s17  ;;  %p3145_p7 = scmp.lt.u32.totalorder %s3138_s17, %s3633_s5 }
  0x46   : > { %p3141_p3 = pnand %p3139_p2, %p3409_p0 }
  0x48   : > { %p3142_p4 = pneg %p3141_p3 }
  0x4a   : > { %p3147_p8 = pnand %p3145_p7, %p3142_p4 }
  0x4c   : > { %3150 = shalt.err (!%p3147_p8)
}
  0x4d   : > { %s3151_s23 = scalar_lea.vmem %s295_s28, 16384  ;;  %p3159_p6 = scmp.lt.s32.totalorder %s295_s28, %s295_s28 }
  0x4e   : > { %p3152_p11 = scmp.ne.s32.totalorder %s295_s28, %s3151_s23  ;;  %p3160_p9 = scmp.lt.s32.totalorder %s3151_s23, %s3151_s23 }
  0x50   : > { %p3154_p13 = pnand %p3152_p11, %p3409_p0  ;;  %p3161_p5 = por %p3160_p9, %p3159_p6 }
  0x52   : > { %p3155_p1 = pneg %p3154_p13 }
  0x54   : > { %p3162_p10 = pnand %p3161_p5, %p3155_p1 }
  0x56   : > { %3165 = shalt.err (!%p3162_p10)
}
  0x57   : > { %s3275_s26 = smov 256   ;;  %s3276_s14 = smov 16  }
  0x58   : > { %2794 = dma.hbm_to_vmem [thread:$0]  (!%p3393_p12), %s3633_s5, 16384, %s295_s28, [#allocation6], %s3275_s26, %s3275_s26, %s3276_s14  }
  0x59   : > { %s3277_s11 = smov [#allocation8]   ;;  %s3166_s22 = scalar_lea.hbm %s3635_s7, 4096 }
  0x5a   : > { %s310_s15 = sshll.u32 %s3277_s11, 4  ;;  %p3167_p5 = scmp.ne.s32.totalorder %s3635_s7, %s3166_s22  ;;  %s311_s15 = int_to_ptr.vmem [resolvable:$true] %s310_s15 }
  0x5b   : > { %p3173_p3 = scmp.lt.u32.totalorder %s3166_s22, %s3635_s7 }
  0x5c   : > { %p3169_p10 = pnand %p3167_p5, %p3409_p0 }
  0x5e   : > { %p3170_p2 = pneg %p3169_p10 }
  0x60   : > { %p3175_p4 = pnand %p3173_p3, %p3170_p2 }
  0x62   : > { %3178 = shalt.err (!%p3175_p4)
}
  0x63   : > { %s3179_s28 = scalar_lea.vmem %s311_s15, 4096  ;;  %p3187_p13 = scmp.lt.s32.totalorder %s311_s15, %s311_s15 }
  0x64   : > { %p3180_p7 = scmp.ne.s32.totalorder %s311_s15, %s3179_s28  ;;  %p3188_p1 = scmp.lt.s32.totalorder %s3179_s28, %s3179_s28 }
  0x66   : > { %p3182_p8 = pnand %p3180_p7, %p3409_p0  ;;  %p3189_p6 = por %p3188_p1, %p3187_p13 }
  0x68   : > { %p3183_p11 = pneg %p3182_p8 }
  0x6a   : > { %p3190_p9 = pnand %p3189_p6, %p3183_p11 }
  0x6c   : > { %3193 = shalt.err (!%p3190_p9)
}
  0x6d   : > { %s3278_s26 = smov 64   ;;  %s3279_s14 = smov 4  }
  0x6e   : > { %2797 = dma.hbm_to_vmem [thread:$0]  (!%p3393_p12), %s3635_s7, 4096, %s311_s15, [#allocation9], %s3278_s26, %s3278_s26, %s3279_s14  }
  0x6f   : > { %p3656_p5 = scmp.ne.s32.totalorder %s3653_s21, 0 }
  0x70   : > { %p3657_p10 = scmp.eq.s32.totalorder (!%p3656_p5), %s3355_s13, 0 }
  0x71   : > { %336 = sbr.rel (%p3656_p5) target bundleno = 1353 (0x549), region = 56 }
  0x78   : > { %3239 = dma.done.wait (%p3657_p10), [#allocation3], 6144   ;;  %p3658_p0 = pmov %p3657_p10 }
  0x7a   : > { %3241 = vsyncadd (%p3658_p0), [#allocation3], 4294961152  ;;  %p3659_p2 = pmov %p3658_p0 }
  0x7b   : > { %p3660_p3 = pmov %p3658_p0 }
  0x7c   : > { %3243 = dma.done.wait (%p3659_p2), [#allocation6], 22528  }
  0x7d   : > { %3245 = vsyncadd (%p3660_p3), [#allocation6], 4294944768  ;;  %p3661_p4 = pmov %p3658_p0 }
  0x7e   : > { %p3662_p12 = pmov %p3658_p0 }
  0x7f   : > { %3247 = dma.done.wait (%p3661_p4), [#allocation9], 4096  }
  0x80   : > { %3249 = vsyncadd (%p3662_p12), [#allocation9], 4294963200  ;;  %v3280_v0 = vmov 0.0|0.0   ;;  %vm3281_vm0 = vmmov 0   ;;  %v3282_v1 = vmov 0.0   ;;  %v390_v2 = vld [vmem:[%s3629_s1] sm:$0xff] }
  0x81   : > { %2641 = vmatprep.subr.bf16.mxu0 %v3280_v0  ;;  %2633 = vmatprep.mubr.msk.f32.mxu0 %vm3281_vm0, %v3282_v1  ;;  %v391_v3 = vld [vmem:[%s3629_s1 + $0x8] sm:$0xff]  ;;  %v392_v4 = vld [vmem:[%s3629_s1 + $0x10] sm:$0xff]  ;;  %v393_v6 = vld [vmem:[%s3629_s1 + $0x18] sm:$0xff]  ;;  %p383_p7 = scmp.lt.s32.totalorder %s3355_s13, 1  ;;  %vm402_vm1 = vcmask 785408   ;;  %vm479_vm2 = vcmask 64512  }
  0x82   : > { %2636 = vmatprep.subr.mxu1 %v3282_v1  ;;  %2638 = vmatprep.mubr.msk.f32.mxu1 %vm3281_vm0, %v3282_v1  ;;  %v2642_v5 = vpack.c.bf16 %v391_v3, %v390_v2  ;;  %v2645_v7 = vpack.c.bf16 %v393_v6, %v392_v4  ;;  %v394_v8 = vld [vmem:[%s3629_s1 + $0x20] sm:$0xff]  ;;  %v395_v9 = vld [vmem:[%s3629_s1 + $0x28] sm:$0xff]  ;;  %v396_v10 = vld [vmem:[%s3629_s1 + $0x30] sm:$0xff]  ;;  %s2547_s11 = sshll.u32 %s3355_s13, 7  ;;  %p3663_p11 = scmp.ne.s32.totalorder %s3650_s19, 0 }
  0x83   : > { %v397_v11 = vld [vmem:[%s3629_s1 + $0x38] sm:$0xff]  ;;  %v2648_v12 = vpack.c.bf16 %v395_v9, %v394_v8  ;;  %s384_s30 = scalar_select %p383_p7, %s3355_s13, 1  ;;  %v398_v13 = vld [vmem:[%s3629_s1 + $0x40] sm:$0xff]  ;;  %v399_v14 = vld [vmem:[%s3629_s1 + $0x48] sm:$0xff] }
  0x84   : > { %2643 = vmatpush3.bf16.msra.mxu0 %v2642_v5  ;;  %v2651_v15 = vpack.c.bf16 %v397_v11, %v396_v10  ;;  %v400_v16 = vld [vmem:[%s3629_s1 + $0x50] sm:$0xff]  ;;  %v401_v17 = vld [vmem:[%s3629_s1 + $0x58] sm:$0xff]  ;;  %v2654_v18 = vpack.c.bf16 %v399_v14, %v398_v13  ;;  %v478_v22 = vld [vmem:[%s3630_s2] sm:$0xff]  ;;  %s3586_s25 = scalar_lea.hbm %s3637_s9, %s2547_s11  ;;  %s3283_s13 = smov [#allocation10]  }
  0x85   : > { %2644 = vmatprep.subr.bf16.mxu0 %v3280_v0  ;;  %s2378_s15 = sshll.u32 %s384_s30, 3  ;;  %v2657_v20 = vpack.c.bf16 %v401_v17, %v400_v16  ;;  %2637 = vmatpush3.msra.mxu1 %v478_v22  ;;  %v555_v23 = vld [vmem:[#allocation2 + $0x8] sm:$0xff]  ;;  %v557_v25 = vld [vmem:[#allocation2 + $0x18] sm:$0xff]  ;;  %v556_v29 = vld [vmem:[#allocation2 + $0x10] sm:$0xff]  ;;  %s380_s30 = sand.u32 1, %s3260_s10  }
  0x86   : > { %s386_s23 = scalar_lea.vmem %s3628_s0, %s2378_s15  ;;  %v559_v24 = vld [vmem:[#allocation2 + $0x28] sm:$0xff]  ;;  %v561_v27 = vld [vmem:[#allocation2 + $0x38] sm:$0xff]  ;;  %v560_v30 = vld [vmem:[#allocation2 + $0x30] sm:$0xff]  ;;  %s2377_s18 = sshll.u32 %s380_s30, 3 }
  0x87   : > { %v3548_v19 = vld [vmem:[%s386_s23] sm:$0xff]  ;;  %v2659_v26 = vpack.c.bf16 %v559_v24, %v555_v23  ;;  %v2683_v28 = vpack.c.bf16 %v561_v27, %v557_v25  ;;  %v2685_v31 = vpack.c.bf16 %v560_v30, %v556_v29  ;;  %v565_v32 = vld [vmem:[#allocation2 + $0x58] sm:$0xff]  ;;  %v564_v35 = vld [vmem:[#allocation2 + $0x50] sm:$0xff]  ;;  %s382_s15 = scalar_lea.vmem [#allocation10], %s2377_s18  ;;  %s2252_s27 = scalar_lea.sflag [#allocation4], %s380_s30 }
  0x88   : > { %2646 = vmatpush3.bf16.msra.mxu0 %v2645_v7  ;;  %v389_v21 = vmul.f32 %v3548_v19, %v3548_v19  ;;  %v569_v33 = vld [vmem:[#allocation2 + $0x78] sm:$0xff]  ;;  %v568_v36 = vld [vmem:[#allocation2 + $0x70] sm:$0xff]  ;;  %v554_v2 = vld [vmem:[#allocation2] sm:$0xff]  ;;  %s2265_s20 = sshll.u32 %s382_s15, 4  ;;  %s3198_s23 = sshll.u32 %s3283_s13, 4  ;;  %s3588_s20 = int_to_ptr.vmem [resolvable:$true] %s2265_s20  ;;  %s3199_s23 = int_to_ptr.vmem [resolvable:$false] %s3198_s23 }
  0x89   : > { %2647 = vmatprep.subr.bf16.mxu0 %v3280_v0  ;;  %2660 = vmatprep.subr.bf16.mxu1 %v2659_v26  ;;  %v2687_v34 = vpack.c.bf16 %v569_v33, %v565_v32  ;;  %v2689_v37 = vpack.c.bf16 %v568_v36, %v564_v35  ;;  %v573_v38 = vld [vmem:[#allocation2 + $0x98] sm:$0xff]  ;;  %v572_v41 = vld [vmem:[#allocation2 + $0x90] sm:$0xff]  ;;  %v558_v3 = vld [vmem:[#allocation2 + $0x20] sm:$0xff]  ;;  %s3194_s29 = scalar_lea.vmem %s3588_s20, 128  ;;  %s3200_s28 = scalar_lea.vmem %s3199_s23, 256 }
  0x8a   : > { %v577_v39 = vld [vmem:[#allocation2 + $0xb8] sm:$0xff]  ;;  %v576_v42 = vld [vmem:[#allocation2 + $0xb0] sm:$0xff]  ;;  %v563_v4 = vld [vmem:[#allocation2 + $0x48] sm:$0xff]  ;;  %v2661_v6 = vpack.c.bf16 %v558_v3, %v554_v2  ;;  %p3195_p8 = scmp.ne.s32.totalorder %s3588_s20, %s3194_s29  ;;  %p3201_p6 = scmp.lt.s32.totalorder %s3588_s20, %s3199_s23 }
  0x8b   : > { %v2691_v40 = vpack.c.bf16 %v577_v39, %v573_v38  ;;  %v2693_v43 = vpack.c.bf16 %v576_v42, %v572_v41  ;;  %v581_v44 = vld [vmem:[#allocation2 + $0xd8] sm:$0xff]  ;;  %v580_v47 = vld [vmem:[#allocation2 + $0xd0] sm:$0xff]  ;;  %v567_v5 = vld [vmem:[#allocation2 + $0x68] sm:$0xff]  ;;  %p3202_p9 = scmp.lt.s32.totalorder %s3200_s28, %s3194_s29 }
  0x8c   : > { %2649 = vmatpush3.bf16.msra.mxu0 %v2648_v12  ;;  %v585_v45 = vld [vmem:[#allocation2 + $0xf8] sm:$0xff]  ;;  %v584_v48 = vld [vmem:[#allocation2 + $0xf0] sm:$0xff]  ;;  %v2663_v7 = vpack.c.bf16 %v567_v5, %v563_v4  ;;  %v562_v8 = vld [vmem:[#allocation2 + $0x40] sm:$0xff]  ;;  %p3196_p13 = pnand %p3195_p8, %p3663_p11 }
  0x8d   : > { %2650 = vmatprep.subr.bf16.mxu0 %v3280_v0  ;;  %v2695_v46 = vpack.c.bf16 %v585_v45, %v581_v44  ;;  %v2697_v49 = vpack.c.bf16 %v584_v48, %v580_v47  ;;  %v589_v50 = vld [vmem:[#allocation2 + $0x118] sm:$0xff]  ;;  %v588_v53 = vld [vmem:[#allocation2 + $0x110] sm:$0xff]  ;;  %v566_v9 = vld [vmem:[#allocation2 + $0x60] sm:$0xff]  ;;  %p3203_p5 = por %p3202_p9, %p3201_p6 }
  0x8e   : > { %v593_v51 = vld [vmem:[#allocation2 + $0x138] sm:$0xff]  ;;  %v592_v54 = vld [vmem:[#allocation2 + $0x130] sm:$0xff]  ;;  %v571_v11 = vld [vmem:[#allocation2 + $0x88] sm:$0xff]  ;;  %v2665_v13 = vpack.c.bf16 %v566_v9, %v562_v8  ;;  %p3197_p1 = pneg %p3196_p13 }
  0x8f   : > { %v2699_v52 = vpack.c.bf16 %v593_v51, %v589_v50  ;;  %v2701_v55 = vpack.c.bf16 %v592_v54, %v588_v53  ;;  %v597_v56 = vld [vmem:[#allocation2 + $0x158] sm:$0xff]  ;;  %v596_v59 = vld [vmem:[#allocation2 + $0x150] sm:$0xff]  ;;  %v575_v12 = vld [vmem:[#allocation2 + $0xa8] sm:$0xff] }
  0x90   : > { %2652 = vmatpush3.bf16.msra.mxu0 %v2651_v15  ;;  %v601_v57 = vld [vmem:[#allocation2 + $0x178] sm:$0xff]  ;;  %v600_v60 = vld [vmem:[#allocation2 + $0x170] sm:$0xff]  ;;  %v2667_v14 = vpack.c.bf16 %v575_v12, %v571_v11  ;;  %v570_v15 = vld [vmem:[#allocation2 + $0x80] sm:$0xff]  ;;  %p3204_p10 = pnand %p3203_p5, %p3197_p1 }
  0x91   : > { %2653 = vmatprep.subr.bf16.mxu0 %v3280_v0  ;;  %v2703_v58 = vpack.c.bf16 %v601_v57, %v597_v56  ;;  %v2705_v61 = vpack.c.bf16 %v600_v60, %v596_v59  ;;  %v574_v16 = vld [vmem:[#allocation2 + $0xa0] sm:$0xff]  ;;  %v579_v17 = vld [vmem:[#allocation2 + $0xc8] sm:$0xff]  ;;  %v750_v39 = vld [vmem:[#allocation5 + $0x18] sm:$0xff] }
  0x92   : > { %v578_v22 = vld [vmem:[#allocation2 + $0xc0] sm:$0xff]  ;;  %v587_v24 = vld [vmem:[#allocation2 + $0x108] sm:$0xff]  ;;  %v754_v41 = vld [vmem:[#allocation5 + $0x38] sm:$0xff] }
  0x93   : > { %v582_v23 = vld [vmem:[#allocation2 + $0xe0] sm:$0xff]  ;;  %v591_v25 = vld [vmem:[#allocation2 + $0x128] sm:$0xff]  ;;  %v2731_v42 = vpack.c.bf16 %v754_v41, %v750_v39  ;;  %v749_v45 = vld [vmem:[#allocation5 + $0x10] sm:$0xff] }
  0x94   : > { %2655 = vmatpush3.bf16.msra.mxu0 %v2654_v18  ;;  %v583_v18 = vld [vmem:[#allocation2 + $0xe8] sm:$0xff]  ;;  %v2673_v26 = vpack.c.bf16 %v582_v23, %v578_v22  ;;  %v2675_v27 = vpack.c.bf16 %v591_v25, %v587_v24  ;;  %v590_v29 = vld [vmem:[#allocation2 + $0x120] sm:$0xff]  ;;  %v762_v50 = vld [vmem:[#allocation5 + $0x78] sm:$0xff] }
  0x95   : > { %2656 = vmatprep.subr.bf16.mxu0 %v3280_v0  ;;  %v595_v30 = vld [vmem:[#allocation2 + $0x148] sm:$0xff]  ;;  %v598_v35 = vld [vmem:[#allocation2 + $0x160] sm:$0xff]  ;;  %v757_v60 = vld [vmem:[#allocation5 + $0x50] sm:$0xff] }
  0x96   : > { %v752_v38 = vld [vmem:[#allocation5 + $0x28] sm:$0xff]  ;;  %v751_v44 = vld [vmem:[#allocation5 + $0x20] sm:$0xff]  ;;  %v770_v2 = vld [vmem:[#allocation5 + $0xb8] sm:$0xff] }
  0x97   : > { %v756_v47 = vld [vmem:[#allocation5 + $0x48] sm:$0xff]  ;;  %v755_v54 = vld [vmem:[#allocation5 + $0x40] sm:$0xff]  ;;  %v765_v8 = vld [vmem:[#allocation5 + $0x90] sm:$0xff] }
  0x98   : > { %2658 = vmatpush3.bf16.msra.mxu0 %v2657_v20  ;;  %v2669_v20 = vpack.c.bf16 %v574_v16, %v570_v15  ;;  %v760_v48 = vld [vmem:[#allocation5 + $0x68] sm:$0xff]  ;;  %v763_v4 = vld [vmem:[#allocation5 + $0x80] sm:$0xff]  ;;  %v769_v9 = vld [vmem:[#allocation5 + $0xb0] sm:$0xff] }
  0x99   : > { %2684 = vmatprep.subr.bf16.mxu0 %v2683_v28  ;;  %v586_v28 = vld [vmem:[#allocation2 + $0x100] sm:$0xff]  ;;  %v776_v11 = vld [vmem:[#allocation5 + $0xe8] sm:$0xff]  ;;  %v774_v12 = vld [vmem:[#allocation5 + $0xd8] sm:$0xff]  ;;  %v2741_v15 = vpack.c.bf16 %v769_v9, %v765_v8 }
  0x9a   : > { %v2677_v32 = vpack.c.bf16 %v590_v29, %v586_v28  ;;  %v767_v5 = vld [vmem:[#allocation5 + $0xa0] sm:$0xff]  ;;  %v777_v22 = vld [vmem:[#allocation5 + $0xf0] sm:$0xff]  ;;  %v780_v23 = vld [vmem:[#allocation5 + $0x108] sm:$0xff] }
  0x9b   : > { %2634 = vmatmul.mubr.msk.f32.vlgmr.msra.gmra.mrb[0].mxu0 %vm402_vm1, %v389_v21  ;;  %v2671_v21 = vpack.c.bf16 %v583_v18, %v579_v17  ;;  %v771_v16 = vld [vmem:[#allocation5 + $0xc0] sm:$0xff]  ;;  %v784_v24 = vld [vmem:[#allocation5 + $0x128] sm:$0xff]  ;;  %v782_v25 = vld [vmem:[#allocation5 + $0x118] sm:$0xff] }
  0x9c   : > { %740 = vmatprep.mubr.f32.mxu0 %v3282_v1  ;;  %2686 = vmatpush1.bf16.msra.mxu0 %v2685_v31  ;;  %v599_v31 = vld [vmem:[#allocation2 + $0x168] sm:$0xff]  ;;  %v775_v17 = vld [vmem:[#allocation5 + $0xe0] sm:$0xff] }
  0x9d   : > { %2688 = vmatprep.subr.bf16.mxu0 %v2687_v34  ;;  %v2679_v33 = vpack.c.bf16 %v599_v31, %v595_v30  ;;  %v594_v34 = vld [vmem:[#allocation2 + $0x140] sm:$0xff]  ;;  %v2723_v30 = vpack.c.bf16 %v784_v24, %v780_v23  ;;  %v2897_v9 = vld [vmem:[#allocation7 + $0xcc] ss:$16 sps:$4 sm:$0xff]   ;;  %v2913_v24 = vld [vmem:[#allocation7 + $0x128] ss:$16 sps:$4 sm:$0xff]  }
  0x9e   : > { %v2681_v36 = vpack.c.bf16 %v598_v35, %v594_v34  ;;  %v779_v28 = vld [vmem:[#allocation5 + $0x100] sm:$0xff]  ;;  %v788_v34 = vld [vmem:[#allocation5 + $0x148] sm:$0xff] }
  0x9f   : > { %v783_v29 = vld [vmem:[#allocation5 + $0x120] sm:$0xff]  ;;  %v792_v35 = vld [vmem:[#allocation5 + $0x168] sm:$0xff] }
  0xa0   : > { %2690 = vmatpush1.bf16.msra.mxu0 %v2689_v37  ;;  %v748_v37 = vld [vmem:[#allocation5 + $0x8] sm:$0xff]  ;;  %v2727_v41 = vpack.c.bf16 %v792_v35, %v788_v34  ;;  %v2894_v8 = vld [vmem:[#allocation7 + $0xc4] ss:$16 sps:$4 sm:$0xff]   ;;  %v2910_v23 = vld [vmem:[#allocation7 + $0x120] ss:$16 sps:$4 sm:$0xff]  }
  0xa1   : > { %2692 = vmatprep.subr.bf16.mxu0 %v2691_v40  ;;  %v2707_v40 = vpack.c.bf16 %v752_v38, %v748_v37  ;;  %v794_v37 = vld [vmem:[#allocation5 + $0x178] sm:$0xff]  ;;  %v2725_v38 = vpack.c.bf16 %v783_v29, %v779_v28  ;;  %v2924_v28 = vld [vmem:[#allocation7 + $0x164] ss:$16 sps:$4 sm:$0xff]   ;;  %v2928_v34 = vld [vmem:[#allocation7 + $0x180] ss:$16 sps:$4 sm:$0xff]  }
  0xa2   : > { %v2927_v29 = vld [vmem:[#allocation7 + $0x16c] ss:$16 sps:$4 sm:$0xff]   ;;  %v2931_v35 = vld [vmem:[#allocation7 + $0x188] ss:$16 sps:$4 sm:$0xff]  }
  0xa4   : > { %2694 = vmatpush1.bf16.msra.mxu0 %v2693_v43  ;;  %v747_v43 = vld [vmem:[#allocation5] sm:$0xff] }
  0xa5   : > { %2696 = vmatprep.subr.bf16.mxu0 %v2695_v46  ;;  %v753_v46 = vld [vmem:[#allocation5 + $0x30] sm:$0xff] }
  0xa6   : > { %v2733_v53 = vpack.c.bf16 %v753_v46, %v749_v45  ;;  %v793_v45 = vld [vmem:[#allocation5 + $0x170] sm:$0xff] }
  0xa8   : > { %2698 = vmatpush1.bf16.msra.mxu0 %v2697_v49  ;;  %v758_v49 = vld [vmem:[#allocation5 + $0x58] sm:$0xff] }
  0xa9   : > { %2700 = vmatprep.subr.bf16.mxu0 %v2699_v52  ;;  %v2709_v52 = vpack.c.bf16 %v751_v44, %v747_v43  ;;  %v2735_v59 = vpack.c.bf16 %v762_v50, %v758_v49  ;;  %v791_v43 = vld [vmem:[#allocation5 + $0x160] sm:$0xff]  ;;  %v789_v44 = vld [vmem:[#allocation5 + $0x150] sm:$0xff]  ;;  %v2861_v49 = vld [vmem:[#allocation7 + $0xc] ss:$16 sps:$4 sm:$0xff]  }
  0xaa   : > { %v2856_v50 = vld [vmem:[#allocation7] ss:$16 sps:$4 sm:$0xff]  }
  0xac   : > { %2702 = vmatpush1.bf16.msra.mxu0 %v2701_v55  ;;  %v759_v55 = vld [vmem:[#allocation5 + $0x60] sm:$0xff] }
  0xad   : > { %2704 = vmatprep.subr.bf16.mxu0 %v2703_v58  ;;  %v2711_v58 = vpack.c.bf16 %v760_v48, %v756_v47  ;;  %v2713_v3 = vpack.c.bf16 %v759_v55, %v755_v54  ;;  %v2753_v47 = vpack.c.bf16 %v793_v45, %v789_v44  ;;  %v2858_v48 = vld [vmem:[#allocation7 + $0x4] ss:$16 sps:$4 sm:$0xff]   ;;  %v2862_v54 = vld [vmem:[#allocation7 + $0x20] ss:$16 sps:$4 sm:$0xff]   ;;  %v2865_v55 = vld [vmem:[#allocation7 + $0x28] ss:$16 sps:$4 sm:$0xff]  }
  0xae   : > { %v2948_v44 = vld [vmem:[#allocation7 + $0x1e4] ss:$16 sps:$4 sm:$0xff]   ;;  %v2951_v45 = vld [vmem:[#allocation7 + $0x1ec] ss:$16 sps:$4 sm:$0xff]  }
  0xb0   : > { %2706 = vmatpush1.bf16.msra.mxu0 %v2705_v61  ;;  %v761_v61 = vld [vmem:[#allocation5 + $0x70] sm:$0xff] }
  0xb1   : > { %2732 = vmatprep.subr.bf16.mxu0 %v2731_v42 }
 0x16e   : > { %v472_v62 = vpop.f32.mrb[0].mxu0 }
 0x16f   : > { %v476_v63 = vmax.f32 %v472_v62, 1e-24  ;;  %v2635_v0 = vpop.f32.mrb[1].mxu0  ;;  %v764_v62 = vld [vmem:[#allocation5 + $0x88] sm:$0xff] }
 0x170   : > { %v766_v0 = vld [vmem:[#allocation5 + $0x98] sm:$0xff] }
 0x171   : > { %3080 = vrsqrt.f32 %v476_v63  ;;  %v768_v63 = vld [vmem:[#allocation5 + $0xa8] sm:$0xff] }
 0x17b   : > { %v3081_v10 = vpop.eup %3080 }
 0x17c   : > { %2639 = vmatmul.mubr.msk.f32.vlgmr.msra.gmra.mrb[0].mxu1 %vm479_vm2, %v3081_v10  ;;  %v772_v10 = vld [vmem:[#allocation5 + $0xc8] sm:$0xff] }
 0x17d   : > { %2662 = vmatpush1.bf16.msra.mxu1 %v2661_v6  ;;  %669 = vmatprep.mubr.f32.mxu1 %v3282_v1  ;;  %v2715_v6 = vpack.c.bf16 %v768_v63, %v764_v62  ;;  %v2719_v18 = vpack.c.bf16 %v776_v11, %v772_v10  ;;  %v2879_v62 = vld [vmem:[#allocation7 + $0x6c] ss:$16 sps:$4 sm:$0xff]   ;;  %v2874_v63 = vld [vmem:[#allocation7 + $0x60] ss:$16 sps:$4 sm:$0xff]   ;;  %v2895_v11 = vld [vmem:[#allocation7 + $0xc8] ss:$16 sps:$4 sm:$0xff]  }
 0x17e   : > { %2664 = vmatprep.subr.bf16.mxu1 %v2663_v7  ;;  %v2739_v7 = vpack.c.bf16 %v770_v2, %v766_v0  ;;  %v2882_v0 = vld [vmem:[#allocation7 + $0x84] ss:$16 sps:$4 sm:$0xff]   ;;  %v2885_v2 = vld [vmem:[#allocation7 + $0x8c] ss:$16 sps:$4 sm:$0xff]   ;;  %v2892_v10 = vld [vmem:[#allocation7 + $0xc0] ss:$16 sps:$4 sm:$0xff]  }
 0x181   : > { %2666 = vmatpush1.bf16.msra.mxu1 %v2665_v13  ;;  %v778_v13 = vld [vmem:[#allocation5 + $0xf8] sm:$0xff] }
 0x182   : > { %2668 = vmatprep.subr.bf16.mxu1 %v2667_v14  ;;  %v2717_v14 = vpack.c.bf16 %v767_v5, %v763_v4  ;;  %v2888_v4 = vld [vmem:[#allocation7 + $0xa4] ss:$16 sps:$4 sm:$0xff]   ;;  %v2891_v5 = vld [vmem:[#allocation7 + $0xac] ss:$16 sps:$4 sm:$0xff]  }
 0x185   : > { %2670 = vmatpush1.bf16.msra.mxu1 %v2669_v20  ;;  %v2743_v20 = vpack.c.bf16 %v778_v13, %v774_v12  ;;  %v2900_v12 = vld [vmem:[#allocation7 + $0xe4] ss:$16 sps:$4 sm:$0xff]   ;;  %v2903_v13 = vld [vmem:[#allocation7 + $0xec] ss:$16 sps:$4 sm:$0xff]  }
 0x186   : > { %2672 = vmatprep.subr.bf16.mxu1 %v2671_v21  ;;  %v773_v21 = vld [vmem:[#allocation5 + $0xd0] sm:$0xff] }
 0x189   : > { %2674 = vmatpush1.bf16.msra.mxu1 %v2673_v26  ;;  %v786_v26 = vld [vmem:[#allocation5 + $0x138] sm:$0xff] }
 0x18a   : > { %2676 = vmatprep.subr.bf16.mxu1 %v2675_v27  ;;  %v2721_v27 = vpack.c.bf16 %v775_v17, %v771_v16  ;;  %v2747_v31 = vpack.c.bf16 %v786_v26, %v782_v25  ;;  %v2906_v16 = vld [vmem:[#allocation7 + $0x104] ss:$16 sps:$4 sm:$0xff]   ;;  %v2909_v17 = vld [vmem:[#allocation7 + $0x10c] ss:$16 sps:$4 sm:$0xff]  }
 0x18b   : > { %v2918_v25 = vld [vmem:[#allocation7 + $0x144] ss:$16 sps:$4 sm:$0xff]   ;;  %v2921_v26 = vld [vmem:[#allocation7 + $0x14c] ss:$16 sps:$4 sm:$0xff]  }
 0x18d   : > { %2678 = vmatpush1.bf16.msra.mxu1 %v2677_v32  ;;  %v781_v32 = vld [vmem:[#allocation5 + $0x110] sm:$0xff] }
 0x18e   : > { %2680 = vmatprep.subr.bf16.mxu1 %v2679_v33  ;;  %v785_v33 = vld [vmem:[#allocation5 + $0x130] sm:$0xff] }
 0x18f   : > { %v2749_v39 = vpack.c.bf16 %v785_v33, %v781_v32  ;;  %v2930_v32 = vld [vmem:[#allocation7 + $0x184] ss:$16 sps:$4 sm:$0xff]   ;;  %v2933_v33 = vld [vmem:[#allocation7 + $0x18c] ss:$16 sps:$4 sm:$0xff]  }
 0x191   : > { %2682 = vmatpush1.bf16.msra.mxu1 %v2681_v36  ;;  %v790_v36 = vld [vmem:[#allocation5 + $0x158] sm:$0xff] }
 0x192   : > { %2708 = vmatprep.subr.bf16.mxu1 %v2707_v40  ;;  %v787_v40 = vld [vmem:[#allocation5 + $0x140] sm:$0xff]  ;;  %v2751_v42 = vpack.c.bf16 %v794_v37, %v790_v36  ;;  %v2939_v37 = vld [vmem:[#allocation7 + $0x1ac] ss:$16 sps:$4 sm:$0xff]  }
 0x193   : > { %v2729_v46 = vpack.c.bf16 %v791_v43, %v787_v40  ;;  %v2936_v36 = vld [vmem:[#allocation7 + $0x1a4] ss:$16 sps:$4 sm:$0xff]   ;;  %v2943_v43 = vld [vmem:[#allocation7 + $0x1c8] ss:$16 sps:$4 sm:$0xff]  }
 0x194   : > { %v2942_v40 = vld [vmem:[#allocation7 + $0x1c4] ss:$16 sps:$4 sm:$0xff]  }
 0x24f   : > { %v549_v51 = vpop.f32.mrb[0].mxu1 }
 0x250   : > { %v3559_v56 = vmul.f32 %v549_v51, %v3548_v19  ;;  %v2640_v57 = vpop.f32.mrb[1].mxu1  ;;  %v2737_v19 = vpack.c.bf16 %v761_v61, %v757_v60  ;;  %v2859_v51 = vld [vmem:[#allocation7 + $0x8] ss:$16 sps:$4 sm:$0xff]   ;;  %v2876_v61 = vld [vmem:[#allocation7 + $0x64] ss:$16 sps:$4 sm:$0xff]  }
 0x251   : > { %v2870_v57 = vld [vmem:[#allocation7 + $0x44] ss:$16 sps:$4 sm:$0xff]   ;;  %v2871_v60 = vld [vmem:[#allocation7 + $0x48] ss:$16 sps:$4 sm:$0xff]  }
 0x252   : > { %2381 = vmatmul.mubr.msk.f32.vlgmr.msra.gmra.mrb[2].mxu1 %vm402_vm1, %v3559_v56  ;;  %2382 = vmatmul.mubr.msk.f32.vlgmr.msra.gmra.mrb[2].mxu0 %vm402_vm1, %v3559_v56 }
 0x253   : > { %2710 = vmatpush1.bf16.msra.mxu1 %v2709_v52  ;;  %2734 = vmatpush1.bf16.msra.mxu0 %v2733_v53  ;;  %v2864_v52 = vld [vmem:[#allocation7 + $0x24] ss:$16 sps:$4 sm:$0xff]   ;;  %v2867_v53 = vld [vmem:[#allocation7 + $0x2c] ss:$16 sps:$4 sm:$0xff]  }
 0x254   : > { %2712 = vmatprep.subr.bf16.mxu1 %v2711_v58  ;;  %2736 = vmatprep.subr.bf16.mxu0 %v2735_v59  ;;  %v2873_v58 = vld [vmem:[#allocation7 + $0x4c] ss:$16 sps:$4 sm:$0xff]   ;;  %v2868_v59 = vld [vmem:[#allocation7 + $0x40] ss:$16 sps:$4 sm:$0xff]  }
 0x255   : > { %859 = vmatprep.mubr.f32.mxu1 %v3282_v1  ;;  %930 = vmatprep.mubr.f32.mxu0 %v3282_v1  ;;  %v2745_v1 = vpack.c.bf16 %v777_v22, %v773_v21  ;;  %v2912_v21 = vld [vmem:[#allocation7 + $0x124] ss:$16 sps:$4 sm:$0xff]   ;;  %v2915_v22 = vld [vmem:[#allocation7 + $0x12c] ss:$16 sps:$4 sm:$0xff]  }
 0x257   : > { %2714 = vmatpush1.bf16.msra.mxu1 %v2713_v3  ;;  %2738 = vmatpush1.bf16.msra.mxu0 %v2737_v19  ;;  %v2880_v3 = vld [vmem:[#allocation7 + $0x80] ss:$16 sps:$4 sm:$0xff]   ;;  %v2883_v19 = vld [vmem:[#allocation7 + $0x88] ss:$16 sps:$4 sm:$0xff]  }
 0x258   : > { %2716 = vmatprep.subr.bf16.mxu1 %v2715_v6  ;;  %2740 = vmatprep.subr.bf16.mxu0 %v2739_v7  ;;  %v2886_v6 = vld [vmem:[#allocation7 + $0xa0] ss:$16 sps:$4 sm:$0xff]   ;;  %v2889_v7 = vld [vmem:[#allocation7 + $0xa8] ss:$16 sps:$4 sm:$0xff]  }
 0x25b   : > { %2718 = vmatpush1.bf16.msra.mxu1 %v2717_v14  ;;  %2742 = vmatpush1.bf16.msra.mxu0 %v2741_v15  ;;  %v2898_v14 = vld [vmem:[#allocation7 + $0xe0] ss:$16 sps:$4 sm:$0xff]   ;;  %v2901_v15 = vld [vmem:[#allocation7 + $0xe8] ss:$16 sps:$4 sm:$0xff]  }
 0x25c   : > { %2720 = vmatprep.subr.bf16.mxu1 %v2719_v18  ;;  %2744 = vmatprep.subr.bf16.mxu0 %v2743_v20  ;;  %v2904_v18 = vld [vmem:[#allocation7 + $0x100] ss:$16 sps:$4 sm:$0xff]   ;;  %v2907_v20 = vld [vmem:[#allocation7 + $0x108] ss:$16 sps:$4 sm:$0xff]  }
 0x25f   : > { %2722 = vmatpush1.bf16.msra.mxu1 %v2721_v27  ;;  %2746 = vmatpush1.bf16.msra.mxu0 %v2745_v1  ;;  %v2916_v27 = vld [vmem:[#allocation7 + $0x140] ss:$16 sps:$4 sm:$0xff]   ;;  %v2919_v1 = vld [vmem:[#allocation7 + $0x148] ss:$16 sps:$4 sm:$0xff]  }
 0x260   : > { %2724 = vmatprep.subr.bf16.mxu1 %v2723_v30  ;;  %2748 = vmatprep.subr.bf16.mxu0 %v2747_v31  ;;  %v2922_v30 = vld [vmem:[#allocation7 + $0x160] ss:$16 sps:$4 sm:$0xff]   ;;  %v2925_v31 = vld [vmem:[#allocation7 + $0x168] ss:$16 sps:$4 sm:$0xff]  }
 0x263   : > { %2726 = vmatpush1.bf16.msra.mxu1 %v2725_v38  ;;  %2750 = vmatpush1.bf16.msra.mxu0 %v2749_v39  ;;  %v2934_v38 = vld [vmem:[#allocation7 + $0x1a0] ss:$16 sps:$4 sm:$0xff]   ;;  %v2937_v39 = vld [vmem:[#allocation7 + $0x1a8] ss:$16 sps:$4 sm:$0xff]  }
 0x264   : > { %2728 = vmatprep.subr.bf16.mxu1 %v2727_v41  ;;  %2752 = vmatprep.subr.bf16.mxu0 %v2751_v42  ;;  %v2945_v41 = vld [vmem:[#allocation7 + $0x1cc] ss:$16 sps:$4 sm:$0xff]   ;;  %v2940_v42 = vld [vmem:[#allocation7 + $0x1c0] ss:$16 sps:$4 sm:$0xff]  }
 0x267   : > { %2730 = vmatpush1.bf16.msra.mxu1 %v2729_v46  ;;  %2754 = vmatpush1.bf16.msra.mxu0 %v2753_v47  ;;  %v2946_v46 = vld [vmem:[#allocation7 + $0x1e0] ss:$16 sps:$4 sm:$0xff]   ;;  %v2949_v47 = vld [vmem:[#allocation7 + $0x1e8] ss:$16 sps:$4 sm:$0xff]  }
 0x268   : > { %1735 = vmatprep.subr.bf16.mxu1 %v2858_v48  ;;  %1817 = vmatprep.subr.bf16.mxu0 %v2861_v49  ;;  %v2954_v48 = vld [vmem:[#allocation7 + $0x204] ss:$16 sps:$4 sm:$0xff]   ;;  %v2957_v49 = vld [vmem:[#allocation7 + $0x20c] ss:$16 sps:$4 sm:$0xff]  }
 0x26a   : > { %2383 = vmatmul.mubr.msk.f32.vlgmr.msra.gmra.mrb[4].mxu1 %vm402_vm1, %v3559_v56  ;;  %2384 = vmatmul.mubr.msk.f32.vlgmr.msra.gmra.mrb[4].mxu0 %vm402_vm1, %v3559_v56  ;;  %v2877_v56 = vld [vmem:[#allocation7 + $0x68] ss:$16 sps:$4 sm:$0xff]  }
 0x26b   : > { %1736 = vmatpush1.bf16.msra.mxu1 %v2856_v50  ;;  %1818 = vmatpush1.bf16.msra.mxu0 %v2859_v51 }
 0x26c   : > { %1737 = vmatprep.subr.bf16.mxu1 %v2864_v52  ;;  %1819 = vmatprep.subr.bf16.mxu0 %v2867_v53 }
 0x26f   : > { %1738 = vmatpush1.bf16.msra.mxu1 %v2862_v54  ;;  %1820 = vmatpush1.bf16.msra.mxu0 %v2865_v55 }
 0x270   : > { %1739 = vmatprep.subr.bf16.mxu1 %v2870_v57  ;;  %1821 = vmatprep.subr.bf16.mxu0 %v2873_v58 }
 0x273   : > { %1740 = vmatpush1.bf16.msra.mxu1 %v2868_v59  ;;  %1822 = vmatpush1.bf16.msra.mxu0 %v2871_v60 }
 0x274   : > { %1741 = vmatprep.subr.bf16.mxu1 %v2876_v61  ;;  %1823 = vmatprep.subr.bf16.mxu0 %v2879_v62 }
 0x277   : > { %1742 = vmatpush1.bf16.msra.mxu1 %v2874_v63  ;;  %1824 = vmatpush1.bf16.msra.mxu0 %v2877_v56  ;;  %v2952_v56 = vld [vmem:[#allocation7 + $0x200] ss:$16 sps:$4 sm:$0xff]  }
 0x278   : > { %1743 = vmatprep.subr.bf16.mxu1 %v2882_v0  ;;  %1825 = vmatprep.subr.bf16.mxu0 %v2885_v2  ;;  %v2955_v0 = vld [vmem:[#allocation7 + $0x208] ss:$16 sps:$4 sm:$0xff]  }
 0x27b   : > { %1744 = vmatpush1.bf16.msra.mxu1 %v2880_v3  ;;  %1826 = vmatpush1.bf16.msra.mxu0 %v2883_v19  ;;  %v2960_v3 = vld [vmem:[#allocation7 + $0x224] ss:$16 sps:$4 sm:$0xff]   ;;  %v2963_v19 = vld [vmem:[#allocation7 + $0x22c] ss:$16 sps:$4 sm:$0xff]  }
 0x27c   : > { %1745 = vmatprep.subr.bf16.mxu1 %v2888_v4  ;;  %1827 = vmatprep.subr.bf16.mxu0 %v2891_v5  ;;  %v2958_v5 = vld [vmem:[#allocation7 + $0x220] ss:$16 sps:$4 sm:$0xff]  }
 0x27f   : > { %1746 = vmatpush1.bf16.msra.mxu1 %v2886_v6  ;;  %1828 = vmatpush1.bf16.msra.mxu0 %v2889_v7  ;;  %v2961_v6 = vld [vmem:[#allocation7 + $0x228] ss:$16 sps:$4 sm:$0xff]   ;;  %v2966_v7 = vld [vmem:[#allocation7 + $0x244] ss:$16 sps:$4 sm:$0xff]  }
 0x280   : > { %1747 = vmatprep.subr.bf16.mxu1 %v2894_v8  ;;  %1829 = vmatprep.subr.bf16.mxu0 %v2897_v9  ;;  %v2969_v8 = vld [vmem:[#allocation7 + $0x24c] ss:$16 sps:$4 sm:$0xff]   ;;  %v2964_v9 = vld [vmem:[#allocation7 + $0x240] ss:$16 sps:$4 sm:$0xff]  }
 0x283   : > { %1748 = vmatpush1.bf16.msra.mxu1 %v2892_v10  ;;  %1830 = vmatpush1.bf16.msra.mxu0 %v2895_v11  ;;  %v2967_v10 = vld [vmem:[#allocation7 + $0x248] ss:$16 sps:$4 sm:$0xff]   ;;  %v2972_v11 = vld [vmem:[#allocation7 + $0x264] ss:$16 sps:$4 sm:$0xff]  }
 0x284   : > { %1749 = vmatprep.subr.bf16.mxu1 %v2900_v12  ;;  %1831 = vmatprep.subr.bf16.mxu0 %v2903_v13  ;;  %v2975_v12 = vld [vmem:[#allocation7 + $0x26c] ss:$16 sps:$4 sm:$0xff]   ;;  %v2970_v13 = vld [vmem:[#allocation7 + $0x260] ss:$16 sps:$4 sm:$0xff]  }
 0x287   : > { %1750 = vmatpush1.bf16.msra.mxu1 %v2898_v14  ;;  %1832 = vmatpush1.bf16.msra.mxu0 %v2901_v15  ;;  %v2973_v14 = vld [vmem:[#allocation7 + $0x268] ss:$16 sps:$4 sm:$0xff]   ;;  %v2978_v15 = vld [vmem:[#allocation7 + $0x284] ss:$16 sps:$4 sm:$0xff]  }
 0x288   : > { %1751 = vmatprep.subr.bf16.mxu1 %v2906_v16  ;;  %1833 = vmatprep.subr.bf16.mxu0 %v2909_v17  ;;  %v2981_v16 = vld [vmem:[#allocation7 + $0x28c] ss:$16 sps:$4 sm:$0xff]   ;;  %v2976_v17 = vld [vmem:[#allocation7 + $0x280] ss:$16 sps:$4 sm:$0xff]  }
 0x28b   : > { %1752 = vmatpush1.bf16.msra.mxu1 %v2904_v18  ;;  %1834 = vmatpush1.bf16.msra.mxu0 %v2907_v20  ;;  %v2979_v18 = vld [vmem:[#allocation7 + $0x288] ss:$16 sps:$4 sm:$0xff]   ;;  %v2984_v20 = vld [vmem:[#allocation7 + $0x2a4] ss:$16 sps:$4 sm:$0xff]  }
 0x28c   : > { %1753 = vmatprep.subr.bf16.mxu1 %v2912_v21  ;;  %1835 = vmatprep.subr.bf16.mxu0 %v2915_v22  ;;  %v2987_v21 = vld [vmem:[#allocation7 + $0x2ac] ss:$16 sps:$4 sm:$0xff]   ;;  %v2982_v22 = vld [vmem:[#allocation7 + $0x2a0] ss:$16 sps:$4 sm:$0xff]  }
 0x28f   : > { %1754 = vmatpush1.bf16.msra.mxu1 %v2910_v23  ;;  %1836 = vmatpush1.bf16.msra.mxu0 %v2913_v24  ;;  %v2985_v23 = vld [vmem:[#allocation7 + $0x2a8] ss:$16 sps:$4 sm:$0xff]   ;;  %v2990_v24 = vld [vmem:[#allocation7 + $0x2c4] ss:$16 sps:$4 sm:$0xff]  }
 0x290   : > { %1755 = vmatprep.subr.bf16.mxu1 %v2918_v25  ;;  %1837 = vmatprep.subr.bf16.mxu0 %v2921_v26  ;;  %v2993_v25 = vld [vmem:[#allocation7 + $0x2cc] ss:$16 sps:$4 sm:$0xff]   ;;  %v2988_v26 = vld [vmem:[#allocation7 + $0x2c0] ss:$16 sps:$4 sm:$0xff]  }
 0x293   : > { %1756 = vmatpush1.bf16.msra.mxu1 %v2916_v27  ;;  %1838 = vmatpush1.bf16.msra.mxu0 %v2919_v1  ;;  %v2991_v27 = vld [vmem:[#allocation7 + $0x2c8] ss:$16 sps:$4 sm:$0xff]   ;;  %v2996_v1 = vld [vmem:[#allocation7 + $0x2e4] ss:$16 sps:$4 sm:$0xff]  }
 0x294   : > { %1757 = vmatprep.subr.bf16.mxu1 %v2924_v28  ;;  %1839 = vmatprep.subr.bf16.mxu0 %v2927_v29  ;;  %v2999_v28 = vld [vmem:[#allocation7 + $0x2ec] ss:$16 sps:$4 sm:$0xff]   ;;  %v2994_v29 = vld [vmem:[#allocation7 + $0x2e0] ss:$16 sps:$4 sm:$0xff]  }
 0x297   : > { %1758 = vmatpush1.bf16.msra.mxu1 %v2922_v30  ;;  %1840 = vmatpush1.bf16.msra.mxu0 %v2925_v31  ;;  %v2997_v30 = vld [vmem:[#allocation7 + $0x2e8] ss:$16 sps:$4 sm:$0xff]   ;;  %v3002_v31 = vld [vmem:[#allocation7 + $0x304] ss:$16 sps:$4 sm:$0xff]  }
 0x298   : > { %1759 = vmatprep.subr.bf16.mxu1 %v2930_v32  ;;  %1841 = vmatprep.subr.bf16.mxu0 %v2933_v33  ;;  %v3005_v32 = vld [vmem:[#allocation7 + $0x30c] ss:$16 sps:$4 sm:$0xff]   ;;  %v3000_v33 = vld [vmem:[#allocation7 + $0x300] ss:$16 sps:$4 sm:$0xff]  }
 0x29b   : > { %1760 = vmatpush1.bf16.msra.mxu1 %v2928_v34  ;;  %1842 = vmatpush1.bf16.msra.mxu0 %v2931_v35  ;;  %v3003_v34 = vld [vmem:[#allocation7 + $0x308] ss:$16 sps:$4 sm:$0xff]   ;;  %v3008_v35 = vld [vmem:[#allocation7 + $0x324] ss:$16 sps:$4 sm:$0xff]  }
 0x29c   : > { %1761 = vmatprep.subr.bf16.mxu1 %v2936_v36  ;;  %1843 = vmatprep.subr.bf16.mxu0 %v2939_v37  ;;  %v3011_v36 = vld [vmem:[#allocation7 + $0x32c] ss:$16 sps:$4 sm:$0xff]   ;;  %v3006_v37 = vld [vmem:[#allocation7 + $0x320] ss:$16 sps:$4 sm:$0xff]  }
 0x29f   : > { %1762 = vmatpush1.bf16.msra.mxu1 %v2934_v38  ;;  %1844 = vmatpush1.bf16.msra.mxu0 %v2937_v39  ;;  %v3009_v38 = vld [vmem:[#allocation7 + $0x328] ss:$16 sps:$4 sm:$0xff]   ;;  %v3014_v39 = vld [vmem:[#allocation7 + $0x344] ss:$16 sps:$4 sm:$0xff]  }
 0x2a0   : > { %1763 = vmatprep.subr.bf16.mxu1 %v2942_v40  ;;  %1845 = vmatprep.subr.bf16.mxu0 %v2945_v41  ;;  %v3017_v40 = vld [vmem:[#allocation7 + $0x34c] ss:$16 sps:$4 sm:$0xff]   ;;  %v3012_v41 = vld [vmem:[#allocation7 + $0x340] ss:$16 sps:$4 sm:$0xff]  }
 0x2a3   : > { %1764 = vmatpush1.bf16.msra.mxu1 %v2940_v42  ;;  %1846 = vmatpush1.bf16.msra.mxu0 %v2943_v43  ;;  %v3015_v42 = vld [vmem:[#allocation7 + $0x348] ss:$16 sps:$4 sm:$0xff]   ;;  %v3020_v43 = vld [vmem:[#allocation7 + $0x364] ss:$16 sps:$4 sm:$0xff]  }
 0x2a4   : > { %1765 = vmatprep.subr.bf16.mxu1 %v2948_v44  ;;  %1847 = vmatprep.subr.bf16.mxu0 %v2951_v45  ;;  %v3023_v44 = vld [vmem:[#allocation7 + $0x36c] ss:$16 sps:$4 sm:$0xff]   ;;  %v3018_v45 = vld [vmem:[#allocation7 + $0x360] ss:$16 sps:$4 sm:$0xff]  }
 0x2a7   : > { %1766 = vmatpush1.bf16.msra.mxu1 %v2946_v46  ;;  %1848 = vmatpush1.bf16.msra.mxu0 %v2949_v47  ;;  %v3021_v46 = vld [vmem:[#allocation7 + $0x368] ss:$16 sps:$4 sm:$0xff]   ;;  %v3026_v47 = vld [vmem:[#allocation7 + $0x384] ss:$16 sps:$4 sm:$0xff]  }
 0x2a8   : > { %1776 = vmatprep.subr.bf16.mxu1 %v2954_v48  ;;  %1858 = vmatprep.subr.bf16.mxu0 %v2957_v49  ;;  %v3029_v48 = vld [vmem:[#allocation7 + $0x38c] ss:$16 sps:$4 sm:$0xff]   ;;  %v3024_v49 = vld [vmem:[#allocation7 + $0x380] ss:$16 sps:$4 sm:$0xff]  }
 0x325   : > { %v671_v50 = vpop.f32.mrb[2].mxu1  ;;  %v742_v51 = vpop.f32.mrb[2].mxu0 }
 0x326   : > { %v673_v52 = vpop.f32.mrb[3].mxu1  ;;  %v744_v53 = vpop.f32.mrb[3].mxu0 }
 0x33d   : > { %v861_v54 = vpop.f32.mrb[4].mxu1  ;;  %v932_v55 = vpop.f32.mrb[4].mxu0 }
 0x33e   : > { %v937_v57 = vmul.f32 %v861_v54, %v671_v50  ;;  %v3571_v58 = vmul.f32 %v932_v55, %v742_v51  ;;  %v863_v59 = vpop.f32.mrb[5].mxu1  ;;  %v934_v60 = vpop.f32.mrb[5].mxu0  ;;  %v3027_v50 = vld [vmem:[#allocation7 + $0x388] ss:$16 sps:$4 sm:$0xff]   ;;  %v3032_v51 = vld [vmem:[#allocation7 + $0x3a4] ss:$16 sps:$4 sm:$0xff]  }
 0x33f   : > { %v938_v61 = vmul.f32 %v863_v59, %v673_v52  ;;  %v940_v62 = vmul.f32 %v934_v60, %v744_v53  ;;  %v3035_v52 = vld [vmem:[#allocation7 + $0x3ac] ss:$16 sps:$4 sm:$0xff]   ;;  %v3030_v53 = vld [vmem:[#allocation7 + $0x3a0] ss:$16 sps:$4 sm:$0xff]   ;;  %v3033_v54 = vld [vmem:[#allocation7 + $0x3a8] ss:$16 sps:$4 sm:$0xff]  }
 0x340   : > { %v941_v2 = vpack.c.bf16 %v937_v57, %v937_v57  ;;  %v3038_v55 = vld [vmem:[#allocation7 + $0x3c4] ss:$16 sps:$4 sm:$0xff]   ;;  %v3041_v57 = vld [vmem:[#allocation7 + $0x3cc] ss:$16 sps:$4 sm:$0xff]   ;;  %v3036_v59 = vld [vmem:[#allocation7 + $0x3c0] ss:$16 sps:$4 sm:$0xff]  }
 0x341   : > { %v942_v63 = vpack.c.bf16 %v938_v61, %v938_v61  ;;  %v944_v4 = vpack.c.bf16 %v940_v62, %v940_v62  ;;  %v3039_v60 = vld [vmem:[#allocation7 + $0x3c8] ss:$16 sps:$4 sm:$0xff]   ;;  %v3044_v61 = vld [vmem:[#allocation7 + $0x3e4] ss:$16 sps:$4 sm:$0xff]   ;;  %v3047_v62 = vld [vmem:[#allocation7 + $0x3ec] ss:$16 sps:$4 sm:$0xff]  }
 0x343   : > { %1767 = vmatprep.mubr.bf16.mxu1 %v942_v63  ;;  %1849 = vmatprep.mubr.bf16.mxu0 %v942_v63  ;;  %v3042_v63 = vld [vmem:[#allocation7 + $0x3e0] ss:$16 sps:$4 sm:$0xff]  }
 0x344   : > { %1768 = vmatmul.mubr.bf16.vlgmr.msra.gmra.mrb[8].mxu1 %v941_v2  ;;  %1850 = vmatmul.mubr.bf16.vlgmr.msra.gmra.mrb[8].mxu0 %v941_v2  ;;  %v3049_v2 = vld [vmem:[#allocation8 + $0xc0] sm:$0xff]  }
 0x345   : > { %1777 = vmatpush1.bf16.msra.mxu1 %v2952_v56  ;;  %1859 = vmatpush1.bf16.msra.mxu0 %v2955_v0  ;;  %v3045_v56 = vld [vmem:[#allocation7 + $0x3e8] ss:$16 sps:$4 sm:$0xff]   ;;  %v3048_v0 = vld [vmem:[#allocation8 + $0x40] sm:$0xff]  }
 0x346   : > { %1808 = vmatprep.mubr.bf16.mxu1 %v944_v4  ;;  %1890 = vmatprep.mubr.bf16.mxu0 %v944_v4  ;;  %v943_v4 = vpack.c.bf16 %v3571_v58, %v3571_v58  ;;  %v3060_v58 = vld [vmem:[#allocation8 + $0x58] sm:$0xff]  }
 0x347   : > { %1778 = vmatprep.subr.bf16.mxu1 %v2960_v3  ;;  %1860 = vmatprep.subr.bf16.mxu0 %v2963_v19  ;;  %v3050_v3 = vld [vmem:[#allocation8] sm:$0xff]  }
 0x348   : > { %v3051_v19 = vld [vmem:[#allocation8 + $0x80] sm:$0xff]  }
 0x349   : > { %1779 = vmatpush1.bf16.msra.mxu1 %v2958_v5  ;;  %1861 = vmatpush1.bf16.msra.mxu0 %v2961_v6  ;;  %v3052_v5 = vld [vmem:[#allocation8 + $0x48] sm:$0xff]  }
 0x34a   : > { %1780 = vmatprep.subr.bf16.mxu1 %v2966_v7  ;;  %1862 = vmatprep.subr.bf16.mxu0 %v2969_v8  ;;  %v3053_v6 = vld [vmem:[#allocation8 + $0xc8] sm:$0xff]  }
 0x34b   : > { %v3054_v7 = vld [vmem:[#allocation8 + $0x8] sm:$0xff]  }
 0x34c   : > { %v3055_v8 = vld [vmem:[#allocation8 + $0x88] sm:$0xff]  }
 0x34d   : > { %1781 = vmatpush1.bf16.msra.mxu1 %v2964_v9  ;;  %1863 = vmatpush1.bf16.msra.mxu0 %v2967_v10  ;;  %v3056_v9 = vld [vmem:[#allocation8 + $0x50] sm:$0xff]  }
 0x34e   : > { %1782 = vmatprep.subr.bf16.mxu1 %v2972_v11  ;;  %1864 = vmatprep.subr.bf16.mxu0 %v2975_v12  ;;  %v3057_v10 = vld [vmem:[#allocation8 + $0xd0] sm:$0xff]  }
 0x34f   : > { %v3058_v11 = vld [vmem:[#allocation8 + $0x10] sm:$0xff]  }
 0x350   : > { %v3059_v12 = vld [vmem:[#allocation8 + $0x90] sm:$0xff]  }
 0x351   : > { %1783 = vmatpush1.bf16.msra.mxu1 %v2970_v13  ;;  %1865 = vmatpush1.bf16.msra.mxu0 %v2973_v14  ;;  %v3061_v13 = vld [vmem:[#allocation8 + $0xd8] sm:$0xff]  }
 0x352   : > { %1784 = vmatprep.subr.bf16.mxu1 %v2978_v15  ;;  %1866 = vmatprep.subr.bf16.mxu0 %v2981_v16  ;;  %v3062_v14 = vld [vmem:[#allocation8 + $0x18] sm:$0xff]   ;;  %v3064_v16 = vld [vmem:[#allocation8 + $0x60] sm:$0xff]  }
 0x353   : > { %v3063_v15 = vld [vmem:[#allocation8 + $0x98] sm:$0xff]  }
 0x355   : > { %1785 = vmatpush1.bf16.msra.mxu1 %v2976_v17  ;;  %1867 = vmatpush1.bf16.msra.mxu0 %v2979_v18  ;;  %v3065_v17 = vld [vmem:[#allocation8 + $0xe0] sm:$0xff]  }
 0x356   : > { %1786 = vmatprep.subr.bf16.mxu1 %v2984_v20  ;;  %1868 = vmatprep.subr.bf16.mxu0 %v2987_v21  ;;  %v3066_v18 = vld [vmem:[#allocation8 + $0x20] sm:$0xff]   ;;  %v3068_v21 = vld [vmem:[#allocation8 + $0x68] sm:$0xff]  }
 0x357   : > { %v3067_v20 = vld [vmem:[#allocation8 + $0xa0] sm:$0xff]  }
 0x359   : > { %1787 = vmatpush1.bf16.msra.mxu1 %v2982_v22  ;;  %1869 = vmatpush1.bf16.msra.mxu0 %v2985_v23  ;;  %v3069_v22 = vld [vmem:[#allocation8 + $0xe8] sm:$0xff]  }
 0x35a   : > { %1788 = vmatprep.subr.bf16.mxu1 %v2990_v24  ;;  %1870 = vmatprep.subr.bf16.mxu0 %v2993_v25  ;;  %v3070_v23 = vld [vmem:[#allocation8 + $0x28] sm:$0xff]   ;;  %v3072_v25 = vld [vmem:[#allocation8 + $0x70] sm:$0xff]  }
 0x35b   : > { %v3071_v24 = vld [vmem:[#allocation8 + $0xa8] sm:$0xff]  }
 0x35d   : > { %1789 = vmatpush1.bf16.msra.mxu1 %v2988_v26  ;;  %1871 = vmatpush1.bf16.msra.mxu0 %v2991_v27  ;;  %v3073_v26 = vld [vmem:[#allocation8 + $0xf0] sm:$0xff]  }
 0x35e   : > { %1790 = vmatprep.subr.bf16.mxu1 %v2996_v1  ;;  %1872 = vmatprep.subr.bf16.mxu0 %v2999_v28  ;;  %v3074_v27 = vld [vmem:[#allocation8 + $0x30] sm:$0xff]   ;;  %v3076_v28 = vld [vmem:[#allocation8 + $0x78] sm:$0xff]  }
 0x35f   : > { %v3075_v1 = vld [vmem:[#allocation8 + $0xb0] sm:$0xff]  }
 0x361   : > { %1791 = vmatpush1.bf16.msra.mxu1 %v2994_v29  ;;  %1873 = vmatpush1.bf16.msra.mxu0 %v2997_v30  ;;  %v3077_v29 = vld [vmem:[#allocation8 + $0xf8] sm:$0xff]  }
 0x362   : > { %1792 = vmatprep.subr.bf16.mxu1 %v3002_v31  ;;  %1874 = vmatprep.subr.bf16.mxu0 %v3005_v32  ;;  %v3078_v30 = vld [vmem:[#allocation8 + $0x38] sm:$0xff]   ;;  %v1075_v32 = vlaneseq }
 0x363   : > { %v3079_v31 = vld [vmem:[#allocation8 + $0xb8] sm:$0xff]  }
 0x365   : > { %1793 = vmatpush1.bf16.msra.mxu1 %v3000_v33  ;;  %1875 = vmatpush1.bf16.msra.mxu0 %v3003_v34  ;;  %v1076_v33 = vshrl.u32 %v1075_v32, 7 }
 0x366   : > { %1794 = vmatprep.subr.bf16.mxu1 %v3008_v35  ;;  %1876 = vmatprep.subr.bf16.mxu0 %v3011_v36  ;;  %v1073_v36 = vld [vmem:[%s3634_s6] sm:$0xf] }
 0x367   : > { %v1077_v34 = vsub.s32 0, %v1076_v33  ;;  %v1085_v35 = vsub.s32 2, %v1076_v33 }
 0x369   : > { %1795 = vmatpush1.bf16.msra.mxu1 %v3006_v37  ;;  %1877 = vmatpush1.bf16.msra.mxu0 %v3009_v38  ;;  %v1081_v37 = vsub.s32 1, %v1076_v33  ;;  %v1089_v38 = vsub.s32 3, %v1076_v33 }
 0x36a   : > { %1796 = vmatprep.subr.bf16.mxu1 %v3014_v39  ;;  %1878 = vmatprep.subr.bf16.mxu0 %v3017_v40  ;;  %v1078_v39 = vrot.slane %v1073_v36, %v1077_v34  ;;  %v1086_v40 = vrot.slane %v1073_v36, %v1085_v35 }
 0x36d   : > { %1797 = vmatpush1.bf16.msra.mxu1 %v3012_v41  ;;  %1879 = vmatpush1.bf16.msra.mxu0 %v3015_v42  ;;  %v1082_v41 = vrot.slane %v1073_v36, %v1081_v37  ;;  %v1090_v42 = vrot.slane %v1073_v36, %v1089_v38 }
 0x36e   : > { %1798 = vmatprep.subr.bf16.mxu1 %v3020_v43  ;;  %1880 = vmatprep.subr.bf16.mxu0 %v3023_v44 }
 0x371   : > { %1799 = vmatpush1.bf16.msra.mxu1 %v3018_v45  ;;  %1881 = vmatpush1.bf16.msra.mxu0 %v3021_v46 }
 0x372   : > { %1800 = vmatprep.subr.bf16.mxu1 %v3026_v47  ;;  %1882 = vmatprep.subr.bf16.mxu0 %v3029_v48 }
 0x375   : > { %1801 = vmatpush1.bf16.msra.mxu1 %v3024_v49  ;;  %1883 = vmatpush1.bf16.msra.mxu0 %v3027_v50 }
 0x376   : > { %1802 = vmatprep.subr.bf16.mxu1 %v3032_v51  ;;  %1884 = vmatprep.subr.bf16.mxu0 %v3035_v52 }
 0x379   : > { %1803 = vmatpush1.bf16.msra.mxu1 %v3030_v53  ;;  %1885 = vmatpush1.bf16.msra.mxu0 %v3033_v54 }
 0x37a   : > { %1804 = vmatprep.subr.bf16.mxu1 %v3038_v55  ;;  %1886 = vmatprep.subr.bf16.mxu0 %v3041_v57 }
 0x37d   : > { %1805 = vmatpush1.bf16.msra.mxu1 %v3036_v59  ;;  %1887 = vmatpush1.bf16.msra.mxu0 %v3039_v60 }
 0x37e   : > { %1806 = vmatprep.subr.bf16.mxu1 %v3044_v61  ;;  %1888 = vmatprep.subr.bf16.mxu0 %v3047_v62 }
 0x381   : > { %1807 = vmatpush1.bf16.msra.mxu1 %v3042_v63  ;;  %1889 = vmatpush1.bf16.msra.mxu0 %v3045_v56 }
 0x382   : > { %2565 = vmatprep.subr.bf16.mxu1 %v3048_v0  ;;  %2587 = vmatprep.subr.bf16.mxu0 %v3049_v2 }
 0x384   : > { %1809 = vmatmul.mubr.bf16.vlgmr.msra.gmra.mrb[8].mxu1 %v943_v4  ;;  %1891 = vmatmul.mubr.bf16.vlgmr.msra.gmra.mrb[8].mxu0 %v943_v4 }
 0x385   : > { %2566 = vmatpush3.bf16.msra.mxu1 %v3050_v3  ;;  %2588 = vmatpush3.bf16.msra.mxu0 %v3051_v19  ;;  %v2513_v3 = vld [vmem:[%s3636_s8] ss:$0 sm:$0xff] }
 0x386   : > { %2567 = vmatprep.subr.bf16.mxu1 %v3052_v5  ;;  %2589 = vmatprep.subr.bf16.mxu0 %v3053_v6 }
 0x389   : > { %2568 = vmatpush3.bf16.msra.mxu1 %v3054_v7  ;;  %2590 = vmatpush3.bf16.msra.mxu0 %v3055_v8 }
 0x38a   : > { %2569 = vmatprep.subr.bf16.mxu1 %v3056_v9  ;;  %2591 = vmatprep.subr.bf16.mxu0 %v3057_v10 }
 0x38d   : > { %2570 = vmatpush3.bf16.msra.mxu1 %v3058_v11  ;;  %2592 = vmatpush3.bf16.msra.mxu0 %v3059_v12 }
 0x38e   : > { %2571 = vmatprep.subr.bf16.mxu1 %v3060_v58  ;;  %2593 = vmatprep.subr.bf16.mxu0 %v3061_v13 }
 0x391   : > { %2572 = vmatpush3.bf16.msra.mxu1 %v3062_v14  ;;  %2594 = vmatpush3.bf16.msra.mxu0 %v3063_v15 }
 0x392   : > { %2573 = vmatprep.subr.bf16.mxu1 %v3064_v16  ;;  %2595 = vmatprep.subr.bf16.mxu0 %v3065_v17 }
 0x395   : > { %2574 = vmatpush3.bf16.msra.mxu1 %v3066_v18  ;;  %2596 = vmatpush3.bf16.msra.mxu0 %v3067_v20 }
 0x396   : > { %2575 = vmatprep.subr.bf16.mxu1 %v3068_v21  ;;  %2597 = vmatprep.subr.bf16.mxu0 %v3069_v22 }
 0x399   : > { %2576 = vmatpush3.bf16.msra.mxu1 %v3070_v23  ;;  %2598 = vmatpush3.bf16.msra.mxu0 %v3071_v24 }
 0x39a   : > { %2577 = vmatprep.subr.bf16.mxu1 %v3072_v25  ;;  %2599 = vmatprep.subr.bf16.mxu0 %v3073_v26 }
 0x39d   : > { %2578 = vmatpush3.bf16.msra.mxu1 %v3074_v27  ;;  %2600 = vmatpush3.bf16.msra.mxu0 %v3075_v1 }
 0x39e   : > { %2579 = vmatprep.subr.bf16.mxu1 %v3076_v28  ;;  %2601 = vmatprep.subr.bf16.mxu0 %v3077_v29 }
 0x3a1   : > { %2580 = vmatpush3.bf16.msra.mxu1 %v3078_v30  ;;  %2602 = vmatpush3.bf16.msra.mxu0 %v3079_v31 }
 0x457   : > { %v1810_v43 = vpop.f32.mrb[8].mxu1  ;;  %v1892_v44 = vpop.f32.mrb[8].mxu0 }
 0x458   : > { %v2755_v45 = vadd.f32 %v1810_v43, %v1078_v39  ;;  %v2757_v46 = vadd.f32 %v1892_v44, %v1086_v40  ;;  %v1812_v47 = vpop.f32.mrb[9].mxu1  ;;  %v1894_v48 = vpop.f32.mrb[9].mxu0 }
 0x459   : > { %v2756_v49 = vadd.f32 %v1812_v47, %v1082_v41  ;;  %v2758_v50 = vadd.f32 %v1894_v48, %v1090_v42  ;;  %v1814_v51 = vpop.f32.mrb[10].mxu1  ;;  %v1896_v52 = vpop.f32.mrb[10].mxu0 }
 0x45a   : > { %v1899_v53 = vmax.f32 %v2755_v45, 0.0  ;;  %v1901_v54 = vmax.f32 %v2757_v46, 0.0  ;;  %v1815_v55 = vpop.f32.mrb[11].mxu1  ;;  %v1897_v57 = vpop.f32.mrb[11].mxu0 }
 0x45b   : > { %v1900_v59 = vmax.f32 %v2756_v49, 0.0  ;;  %v1902_v60 = vmax.f32 %v2758_v50, 0.0 }
 0x45c   : > { %v1903_v63 = vpack.c.bf16 %v1899_v53, %v1899_v53  ;;  %v1905_v56 = vpack.c.bf16 %v1901_v54, %v1901_v54 }
 0x45d   : > { %v1904_v61 = vpack.c.bf16 %v1900_v59, %v1900_v59  ;;  %v1906_v62 = vpack.c.bf16 %v1902_v60, %v1902_v60 }
 0x45f   : > { %2202 = vmatprep.mubr.bf16.mxu1 %v1904_v61  ;;  %2242 = vmatprep.mubr.bf16.mxu0 %v1906_v62 }
 0x460   : > { %2203 = vmatmul.mubr.bf16.vlgmr.msra.gmra.mrb[12].mxu1 %v1903_v63  ;;  %2243 = vmatmul.mubr.bf16.vlgmr.msra.gmra.mrb[12].mxu0 %v1905_v56 }
 0x533   : > { %v2581_v0 = vpop.f32.mrb[12].mxu1  ;;  %v2603_v2 = vpop.f32.mrb[12].mxu0 }
 0x534   : > { %v2582_v19 = vpop.f32.mrb[13].mxu1  ;;  %v2604_v4 = vpop.f32.mrb[13].mxu0 }
 0x535   : > { %v2583_v5 = vadd.f32 %v2582_v19, %v2581_v0  ;;  %v2605_v6 = vadd.f32 %v2604_v4, %v2603_v2  ;;  %v2584_v7 = vpop.f32.mrb[14].mxu1  ;;  %v2606_v8 = vpop.f32.mrb[14].mxu0 }
 0x536   : > { %v2585_v9 = vpop.f32.mrb[15].mxu1  ;;  %v2607_v10 = vpop.f32.mrb[15].mxu0 }
 0x537   : > { %v2205_v11 = vadd.f32 %v2583_v5, %v2513_v3 }
 0x539   : > { %v2245_v12 = vadd.f32 %v2605_v6, %v2205_v11 }
 0x53b   : > { %2250 = vst [vmem:[%s382_s15] sm:$0xff] %v2245_v12 }
 0x53c   : > { %3207 = shalt.err (!%p3204_p10)
}
 0x53d   : > { %s3208_s26 = scalar_lea.hbm %s3586_s25, 128  ;;  %s3212_s30 = scalar_lea.hbm %s3637_s9, 256 }
 0x53e   : > { %p3209_p0 = scmp.ne.s32.totalorder %s3586_s25, %s3208_s26  ;;  %p3213_p4 = scmp.lt.u32.totalorder %s3586_s25, %s3637_s9 }
 0x53f   : > { %p3214_p12 = scmp.lt.u32.totalorder %s3212_s30, %s3208_s26  ;;  %p3216_p8 = scmp.lt.u32.totalorder %s3208_s26, %s3586_s25 }
 0x540   : > { %p3210_p2 = pnand %p3209_p0, %p3663_p11 }
 0x541   : > { %p3215_p7 = por %p3214_p12, %p3213_p4 }
 0x542   : > { %p3211_p3 = pneg %p3210_p2 }
 0x543   : > { %p3217_p13 = por %p3216_p8, %p3215_p7 }
 0x545   : > { %p3218_p1 = pnand %p3217_p13, %p3211_p3 }
 0x547   : > { %3221 = shalt.err (!%p3218_p1)
}
 0x548   : > { %2783 = dma.vmem_to_hbm [thread:$0]  (%p3663_p11), %s3588_s20, 128, %s3586_s25, %s2252_s27  }
 0x549 PF: > { %s3664_s24 = sld [smem:[#allocation15_spill]]  ;;  %s3665_s11 = sld [smem:[#allocation19_spill]] }
 0x54a   : > { %p2810_p6 = scmp.ge.s32.totalorder %s3268_s12, 2 }
 0x54f   : > { %s2277_s15 = sand.u32 1, %s3664_s24   ;;  %p3666_p9 = scmp.ne.s32.totalorder %s3665_s11, 0 }
 0x550   : > { %s2278_s17 = scalar_lea.sflag [#allocation4], %s2277_s15 }
 0x551   : > { %p2799_p5 = pnand %p2810_p6, %p3666_p9 }
 0x553   : > { %3251 = dma.done.wait (!%p2799_p5), %s2278_s17, 128  }
 0x554   : > { %3253 = vsyncadd (!%p2799_p5), %s2278_s17, 4294967168  ;;  %s3667_s12 = sld [smem:[#allocation17_spill]]  ;;  %s3668_s22 = sld [smem:[#allocation16_spill]] }
 0x555   : > { %s3669_s11 = sld [smem:[#allocation18_spill]]  ;;  %s3670_s30 = smov %s3260_s10 }
 0x55a   : > { %p22_p10 = scmp.ge.s32.totalorder %s3667_s12, 4   ;;  %s3671_s10 = smov %s3668_s22 }
 0x55c   :  { %24 = sbr.rel (!%p22_p10) target bundleno = 6 (0x6), region = 108 }
 0x563   :  { %2283 = vsyncpa [#allocation3], 1 }
 0x564   :  { %2285 = vsyncpa [#allocation3 + $0x1], 1 }
 0x565   :  { %2286 = vsyncpa [#allocation6], 1 }
 0x566   :  { %2287 = vsyncpa [#allocation9], 1 }
 0x567   :  { %2288 = vsyncpa [#allocation4], 1 }
 0x568   :  { %2290 = vsyncpa [#allocation4 + $0x1], 1 }

</bundles_post_ra>
